<compile_context>
chip_gen: v7x
topology: tpu7x:2x2x1
jax: 0.10.0
libtpu: 0.0.40
codegen_flags: <defaults>
</compile_context>

<pallas_src>
import jax
import jax.numpy as jnp
from jax.experimental import pallas as pl
from jax.experimental.pallas import tpu as pltpu

LANE = 128


def _round_up(v, m):
    return (v + m - 1) // m * m


def make_gnn_kernel(hidden_valid):
    """Kernel closure; `hidden_valid` = true (un-padded) hidden width for LN."""
    inv_h = 1.0 / float(hidden_valid)

    def _layer_norm(x, gamma, beta, eps=1e-5):
        # One-pass LayerNorm over the feature lanes.  Padded lanes of x are
        # exactly zero by construction (weights/biases/gamma/beta are
        # zero-padded), so full-lane sums equal sums over the `hidden_valid`
        # real lanes.  max(var, 0) guards fp cancellation in E[x^2]-E[x]^2.
        m = jnp.sum(x, axis=-1, keepdims=True) * inv_h
        s = jnp.sum(x * x, axis=-1, keepdims=True) * inv_h
        var = jnp.maximum(s - m * m, 0.0)
        return (x - m) * jax.lax.rsqrt(var + eps) * gamma + beta

    def kernel(a_ref, x_ref, wf_ref, w2_ref, wp_ref, prm_ref, out_ref):
        hp = wf_ref.shape[1]
        cp = out_ref.shape[1]

        a = a_ref[...]                                     # bf16 [Np, Np]
        prm = prm_ref[...]                                 # f32  [8, max(Hp,Cp)]
        b_fused = prm[0:1, :hp]
        b1, g1, be1 = prm[1:2, :hp], prm[2:3, :hp], prm[3:4, :hp]
        b2, g2, be2 = prm[4:5, :hp], prm[5:6, :hp], prm[6:7, :hp]
        b_post = prm[7:8, :cp]

        # pre_process_mlp folded into layer1 feature transform:
        #   hw = X @ (W_pre @ W1) + (b_pre @ W1)
        hw = jnp.dot(x_ref[...], wf_ref[...],
                     preferred_element_type=jnp.float32) + b_fused
        # layer1_conv (GCN aggregate + bias), layer1_norm, layer1_act
        h = jnp.dot(a, hw.astype(jnp.bfloat16),
                    preferred_element_type=jnp.float32) + b1
        h = jnp.maximum(_layer_norm(h, g1, be1), 0.0)

        # node/edge dropout with p = 0.0 is an exact identity.
        # layer2_conv / layer2_norm / layer2_act
        hw = jnp.dot(h.astype(jnp.bfloat16), w2_ref[...],
                     preferred_element_type=jnp.float32)
        h = jnp.dot(a, hw.astype(jnp.bfloat16),
                    preferred_element_type=jnp.float32) + b2
        h = jnp.maximum(_layer_norm(h, g2, be2), 0.0)

        # post_process_mlp (Cp = 128 -> lane-dense, unmasked vector stores)
        out_ref[...] = jnp.dot(h.astype(jnp.bfloat16), wp_ref[...],
                               preferred_element_type=jnp.float32) + b_post

    return kernel


def gcn_norm_adj(edge_index, num_nodes, num_rows=None):
    """Dense D^-1/2 (A + I_missing) D^-1/2 from edge_index [2, E] (src -> dst).

    Built directly at `num_rows` (>= num_nodes) so no separate pad pass is
    needed.  Duplicate edges sum (PyG message summation); self-loops are added
    only for *real* nodes that do not already have one
    (add_remaining_self_loops), so padded rows/cols stay exactly zero."""
    nr = num_nodes if num_rows is None else num_rows
    src, dst = edge_index[0], edge_index[1]
    a = jnp.zeros((nr, nr), jnp.float32).at[dst, src].add(1.0)
    diag = jnp.diagonal(a)
    needs_loop = (diag == 0.0) & (jnp.arange(nr) < num_nodes)
    a = a + jnp.diag(jnp.where(needs_loop, 1.0, 0.0))
    deg = jnp.sum(a, axis=1)
    dinv = jnp.where(deg > 0, jax.lax.rsqrt(deg), 0.0)
    return dinv[:, None] * a * dinv[None, :]


def gnn_forward(x, edge_index, params):
    (w_pre, b_pre, w1, b1, g1, be1, w2, b2, g2, be2, w_post, b_post) = params
    n, f = x.shape
    hidden = w1.shape[0]
    num_classes = w_post.shape[1]

    # Lane-align every matmul dim, *including* the node dim: A's last dim is a
    # contraction, so n_p % 128 == 0 keeps A lane-dense (unmasked vld) and
    # fills the MXU K dimension.
    n_p = _round_up(n, LANE)
    f_p = _round_up(f, LANE)
    h_p = _round_up(hidden, LANE)
    c_p = _round_up(num_classes, LANE)
    p_w = max(h_p, c_p)

    # Normalized adjacency built directly at padded size, cast once to bf16
    # (halves the dominant A HBM traffic into the kernel).
    a_pad = gcn_norm_adj(edge_index, n, num_rows=n_p).astype(jnp.bfloat16)

    def pad_cast(v, rows, cols):
        return (jnp.zeros((rows, cols), jnp.bfloat16)
                .at[:v.shape[0], :v.shape[1]].set(v.astype(jnp.bfloat16)))

    x_pad = pad_cast(x, n_p, f_p)

    # Fold the pre-MLP into the first GCN feature transform (exact under p=0
    # dropout: no nonlinearity between them).
    w_fused = w_pre @ w1                      # [F, H]
    b_fused = b_pre @ w1                      # [1, H]

    wf_pad = pad_cast(w_fused, f_p, h_p)
    w2_pad = pad_cast(w2, h_p, h_p)
    wp_pad = pad_cast(w_post, h_p, c_p)

    # Pack the 8 tiny row-vector params into one [8, p_w] f32 input (1 DMA).
    def pad_row(r, w):
        return jnp.zeros((w,), jnp.float32).at[:r.shape[0]].set(r)

    prm = jnp.stack([pad_row(b_fused[0], p_w), pad_row(b1[0], p_w),
                     pad_row(g1[0], p_w), pad_row(be1[0], p_w),
                     pad_row(b2[0], p_w), pad_row(g2[0], p_w),
                     pad_row(be2[0], p_w), pad_row(b_post[0], p_w)], axis=0)

    args = (a_pad, x_pad, wf_pad, w2_pad, wp_pad, prm)

    # CostEstimate on the *real* (unpadded) problem dims (advisory for XLA).
    flops = 2 * (n * f * hidden + 2 * n * n * hidden
                 + n * hidden * hidden + n * hidden * num_classes)
    bytes_accessed = (2 * (n * n + n * f + f * hidden + hidden * hidden
                           + hidden * num_classes)
                      + 4 * (8 * p_w + n * num_classes))

    # Single VMEM block, no grid: plain memory_space=VMEM specs, kernel runs
    # once with the full (padded) operands resident in VMEM.
    out = pl.pallas_call(
        make_gnn_kernel(hidden),
        out_shape=jax.ShapeDtypeStruct((n_p, c_p), jnp.float32),
        in_specs=[pl.BlockSpec(memory_space=pltpu.MemorySpace.VMEM)
                  for _ in args],
        out_specs=pl.BlockSpec(memory_space=pltpu.MemorySpace.VMEM),
        cost_estimate=pl.CostEstimate(
            flops=int(flops),
            transcendentals=int(2 * n),
            bytes_accessed=int(bytes_accessed)),
    )(*args)
    # Slice off lane/sublane padding outside the kernel.
    return out[:n, :num_classes]


def gnn_reference(x, edge_index, params):
    """Plain-JAX reference mirroring the kernel math (bf16 MXU, f32 accum)."""
    (w_pre, b_pre, w1, b1, g1, be1, w2, b2, g2, be2, w_post, b_post) = params
    a = gcn_norm_adj(edge_index, x.shape[0]).astype(jnp.bfloat16)
    bf16 = lambda v: v.astype(jnp.bfloat16)
    f32 = jnp.float32

    def ln(v, g, b, eps=1e-5):
        m = jnp.mean(v, -1, keepdims=True)
        var = jnp.mean((v - m) ** 2, -1, keepdims=True)
        return (v - m) * jax.lax.rsqrt(var + eps) * g + b

    hw = jnp.dot(bf16(x), bf16(w_pre @ w1), preferred_element_type=f32) + b_pre @ w1
    h = jnp.dot(a, bf16(hw), preferred_element_type=f32) + b1
    h = jnp.maximum(ln(h, g1, be1), 0.0)
    hw = jnp.dot(bf16(h), bf16(w2), preferred_element_type=f32)
    h = jnp.dot(a, bf16(hw), preferred_element_type=f32) + b2
    h = jnp.maximum(ln(h, g2, be2), 0.0)
    return jnp.dot(bf16(h), bf16(w_post), preferred_element_type=f32) + b_post


def init_params(key, num_node_features, hidden, num_classes):
    ks = jax.random.split(key, 6)
    scale = 0.1
    w_pre = scale * jax.random.normal(ks[0], (num_node_features, hidden), jnp.float32)
    b_pre = jnp.zeros((1, hidden), jnp.float32)
    w1 = scale * jax.random.normal(ks[1], (hidden, hidden), jnp.float32)
    b1 = jnp.zeros((1, hidden), jnp.float32)
    g1 = jnp.ones((1, hidden), jnp.float32)
    be1 = jnp.zeros((1, hidden), jnp.float32)
    w2 = scale * jax.random.normal(ks[2], (hidden, hidden), jnp.float32)
    b2 = jnp.zeros((1, hidden), jnp.float32)
    g2 = jnp.ones((1, hidden), jnp.float32)
    be2 = jnp.zeros((1, hidden), jnp.float32)
    w_post = scale * jax.random.normal(ks[3], (hidden, num_classes), jnp.float32)
    b_post = jnp.zeros((1, num_classes), jnp.float32)
    return (w_pre, b_pre, w1, b1, g1, be1, w2, b2, g2, be2, w_post, b_post)


if __name__ == "__main__":
    # Small, module-consistent shapes.
    N = 64                 # nodes
    E = 256                # edges
    NUM_NODE_FEATURES = 16
    HIDDEN = 32
    NUM_CLASSES = 8

    key = jax.random.PRNGKey(0)
    kx, ke_src, ke_dst, kp = jax.random.split(key, 4)

    x = jax.random.normal(kx, (N, NUM_NODE_FEATURES), jnp.float32)
    edge_index = jnp.stack([
        jax.random.randint(ke_src, (E,), 0, N, dtype=jnp.int32),
        jax.random.randint(ke_dst, (E,), 0, N, dtype=jnp.int32),
    ], axis=0)                                             # [2, E]

    params = init_params(kp, NUM_NODE_FEATURES, HIDDEN, NUM_CLASSES)

    # TODO(synk): dropout_edge / F.dropout with p>0 would need pltpu.prng_seed
    # + pltpu.prng_random_bits masking inside the kernel; with p=0.0 (the
    # configured probabilities) both are exact identities.
    gnn_forward_jit = jax.jit(gnn_forward)   # fuse wrapper glue + pallas_call
    out = gnn_forward_jit(x, edge_index, params)
    out = jax.block_until_ready(out)
    assert out.shape == (N, NUM_CLASSES) and out.dtype == jnp.float32
    assert bool(jnp.all(jnp.isfinite(out)))

    ref = jax.block_until_ready(gnn_reference(x, edge_index, params))
    assert jnp.allclose(out, ref, atol=3e-2, rtol=3e-2), \
        f"max abs diff {float(jnp.max(jnp.abs(out - ref)))}"

    print("KERNEL_OK")
</pallas_src>

<mosaic_0001>
module attributes {stable_mosaic.version = 11 : i64} {
  func.func private @main(%arg0: i32) attributes {dimension_semantics = [#tpu.dimension_semantics<core_parallel>], iteration_bounds = array<i64: 2>, tpu.core_type = #tpu.core_type<sc_scalar_subcore>, window_params = []} {
    return
  }
}

module attributes {stable_mosaic.version = 11 : i64} {
  func.func private @main(%arg0: i32) attributes {dimension_semantics = [#tpu.dimension_semantics<core_parallel>], iteration_bounds = array<i64: 2>, tpu.core_type = #tpu.core_type<sc_scalar_subcore>, window_params = []} {
    return
  }
}

module attributes {stable_mosaic.version = 11 : i64} {
  func.func @kernel(%arg0: memref<128x128xbf16, #tpu.memory_space<vmem>>, %arg1: memref<128x128xbf16, #tpu.memory_space<vmem>>, %arg2: memref<128x128xbf16, #tpu.memory_space<vmem>>, %arg3: memref<128x128xbf16, #tpu.memory_space<vmem>>, %arg4: memref<128x128xbf16, #tpu.memory_space<vmem>>, %arg5: memref<8x128xf32, #tpu.memory_space<vmem>>, %arg6: memref<128x128xf32, #tpu.memory_space<vmem>>) attributes {dimension_semantics = [], scalar_prefetch = 0 : i64, scratch_operands = 0 : i64, tpu.core_type = #tpu.core_type<tc>} {
    %c0 = arith.constant 0 : index
    %c0_0 = arith.constant 0 : index
    %0 = vector.load %arg0[%c0, %c0_0] : memref<128x128xbf16, #tpu.memory_space<vmem>>, vector<128x128xbf16>
    %c0_1 = arith.constant 0 : index
    %c0_2 = arith.constant 0 : index
    %1 = vector.load %arg5[%c0_1, %c0_2] : memref<8x128xf32, #tpu.memory_space<vmem>>, vector<8x128xf32>
    %2 = vector.extract_strided_slice %1 {offsets = [0, 0], sizes = [1, 128], strides = [1, 1]} : vector<8x128xf32> to vector<1x128xf32>
    %3 = vector.extract_strided_slice %1 {offsets = [1, 0], sizes = [1, 128], strides = [1, 1]} : vector<8x128xf32> to vector<1x128xf32>
    %4 = vector.extract_strided_slice %1 {offsets = [2, 0], sizes = [1, 128], strides = [1, 1]} : vector<8x128xf32> to vector<1x128xf32>
    %5 = vector.extract_strided_slice %1 {offsets = [3, 0], sizes = [1, 128], strides = [1, 1]} : vector<8x128xf32> to vector<1x128xf32>
    %6 = vector.extract_strided_slice %1 {offsets = [4, 0], sizes = [1, 128], strides = [1, 1]} : vector<8x128xf32> to vector<1x128xf32>
    %7 = vector.extract_strided_slice %1 {offsets = [5, 0], sizes = [1, 128], strides = [1, 1]} : vector<8x128xf32> to vector<1x128xf32>
    %8 = vector.extract_strided_slice %1 {offsets = [6, 0], sizes = [1, 128], strides = [1, 1]} : vector<8x128xf32> to vector<1x128xf32>
    %9 = vector.extract_strided_slice %1 {offsets = [7, 0], sizes = [1, 128], strides = [1, 1]} : vector<8x128xf32> to vector<1x128xf32>
    %c0_3 = arith.constant 0 : index
    %c0_4 = arith.constant 0 : index
    %10 = vector.load %arg1[%c0_3, %c0_4] : memref<128x128xbf16, #tpu.memory_space<vmem>>, vector<128x128xbf16>
    %c0_5 = arith.constant 0 : index
    %c0_6 = arith.constant 0 : index
    %11 = vector.load %arg2[%c0_5, %c0_6] : memref<128x128xbf16, #tpu.memory_space<vmem>>, vector<128x128xbf16>
    %cst = arith.constant dense<0.000000e+00> : vector<128x128xf32>
    %12 = tpu.matmul %10, %11, %cst {dimension_numbers = #tpu.dot_dimension_numbers<[1], [0], [0], [1], [0, 0, 1, 1], [], []>} : vector<128x128xbf16>, vector<128x128xbf16>, vector<128x128xf32> -> vector<128x128xf32>
    %13 = vector.broadcast %2 : vector<1x128xf32> to vector<128x128xf32>
    %14 = arith.addf %12, %13 : vector<128x128xf32>
    %15 = arith.truncf %14 : vector<128x128xf32> to vector<128x128xbf16>
    %cst_7 = arith.constant dense<0.000000e+00> : vector<128x128xf32>
    %16 = tpu.matmul %0, %15, %cst_7 {dimension_numbers = #tpu.dot_dimension_numbers<[1], [0], [0], [1], [0, 0, 1, 1], [], []>} : vector<128x128xbf16>, vector<128x128xbf16>, vector<128x128xf32> -> vector<128x128xf32>
    %17 = vector.broadcast %3 : vector<1x128xf32> to vector<128x128xf32>
    %18 = arith.addf %16, %17 : vector<128x128xf32>
    %cst_8 = arith.constant dense<0.000000e+00> : vector<128xf32>
    %19 = vector.multi_reduction <add>, %18, %cst_8 [1] : vector<128x128xf32> to vector<128xf32>
    %20 = vector.shape_cast %19 : vector<128xf32> to vector<128x1xf32>
    %cst_9 = arith.constant 3.125000e-02 : f32
    %21 = vector.broadcast %cst_9 : f32 to vector<128x1xf32>
    %22 = arith.mulf %20, %21 : vector<128x1xf32>
    %23 = arith.mulf %18, %18 : vector<128x128xf32>
    %cst_10 = arith.constant dense<0.000000e+00> : vector<128xf32>
    %24 = vector.multi_reduction <add>, %23, %cst_10 [1] : vector<128x128xf32> to vector<128xf32>
    %25 = vector.shape_cast %24 : vector<128xf32> to vector<128x1xf32>
    %cst_11 = arith.constant 3.125000e-02 : f32
    %26 = vector.broadcast %cst_11 : f32 to vector<128x1xf32>
    %27 = arith.mulf %25, %26 : vector<128x1xf32>
    %28 = arith.mulf %22, %22 : vector<128x1xf32>
    %29 = arith.subf %27, %28 : vector<128x1xf32>
    %cst_12 = arith.constant 0.000000e+00 : f32
    %30 = vector.broadcast %cst_12 : f32 to vector<128x1xf32>
    %31 = arith.maximumf %29, %30 : vector<128x1xf32>
    %32 = vector.broadcast %22 : vector<128x1xf32> to vector<128x128xf32>
    %33 = arith.subf %18, %32 : vector<128x128xf32>
    %cst_13 = arith.constant 9.99999974E-6 : f32
    %34 = vector.broadcast %cst_13 : f32 to vector<128x1xf32>
    %35 = arith.addf %31, %34 : vector<128x1xf32>
    %36 = math.rsqrt %35 : vector<128x1xf32>
    %37 = vector.broadcast %36 : vector<128x1xf32> to vector<128x128xf32>
    %38 = arith.mulf %33, %37 : vector<128x128xf32>
    %39 = vector.broadcast %4 : vector<1x128xf32> to vector<128x128xf32>
    %40 = arith.mulf %38, %39 : vector<128x128xf32>
    %41 = vector.broadcast %5 : vector<1x128xf32> to vector<128x128xf32>
    %42 = arith.addf %40, %41 : vector<128x128xf32>
    %cst_14 = arith.constant 0.000000e+00 : f32
    %43 = vector.broadcast %cst_14 : f32 to vector<128x128xf32>
    %44 = arith.maximumf %42, %43 : vector<128x128xf32>
    %45 = arith.truncf %44 : vector<128x128xf32> to vector<128x128xbf16>
    %c0_15 = arith.constant 0 : index
    %c0_16 = arith.constant 0 : index
    %46 = vector.load %arg3[%c0_15, %c0_16] : memref<128x128xbf16, #tpu.memory_space<vmem>>, vector<128x128xbf16>
    %cst_17 = arith.constant dense<0.000000e+00> : vector<128x128xf32>
    %47 = tpu.matmul %45, %46, %cst_17 {dimension_numbers = #tpu.dot_dimension_numbers<[1], [0], [0], [1], [0, 0, 1, 1], [], []>} : vector<128x128xbf16>, vector<128x128xbf16>, vector<128x128xf32> -> vector<128x128xf32>
    %48 = arith.truncf %47 : vector<128x128xf32> to vector<128x128xbf16>
    %cst_18 = arith.constant dense<0.000000e+00> : vector<128x128xf32>
    %49 = tpu.matmul %0, %48, %cst_18 {dimension_numbers = #tpu.dot_dimension_numbers<[1], [0], [0], [1], [0, 0, 1, 1], [], []>} : vector<128x128xbf16>, vector<128x128xbf16>, vector<128x128xf32> -> vector<128x128xf32>
    %50 = vector.broadcast %6 : vector<1x128xf32> to vector<128x128xf32>
    %51 = arith.addf %49, %50 : vector<128x128xf32>
    %cst_19 = arith.constant dense<0.000000e+00> : vector<128xf32>
    %52 = vector.multi_reduction <add>, %51, %cst_19 [1] : vector<128x128xf32> to vector<128xf32>
    %53 = vector.shape_cast %52 : vector<128xf32> to vector<128x1xf32>
    %cst_20 = arith.constant 3.125000e-02 : f32
    %54 = vector.broadcast %cst_20 : f32 to vector<128x1xf32>
    %55 = arith.mulf %53, %54 : vector<128x1xf32>
    %56 = arith.mulf %51, %51 : vector<128x128xf32>
    %cst_21 = arith.constant dense<0.000000e+00> : vector<128xf32>
    %57 = vector.multi_reduction <add>, %56, %cst_21 [1] : vector<128x128xf32> to vector<128xf32>
    %58 = vector.shape_cast %57 : vector<128xf32> to vector<128x1xf32>
    %cst_22 = arith.constant 3.125000e-02 : f32
    %59 = vector.broadcast %cst_22 : f32 to vector<128x1xf32>
    %60 = arith.mulf %58, %59 : vector<128x1xf32>
    %61 = arith.mulf %55, %55 : vector<128x1xf32>
    %62 = arith.subf %60, %61 : vector<128x1xf32>
    %cst_23 = arith.constant 0.000000e+00 : f32
    %63 = vector.broadcast %cst_23 : f32 to vector<128x1xf32>
    %64 = arith.maximumf %62, %63 : vector<128x1xf32>
    %65 = vector.broadcast %55 : vector<128x1xf32> to vector<128x128xf32>
    %66 = arith.subf %51, %65 : vector<128x128xf32>
    %cst_24 = arith.constant 9.99999974E-6 : f32
    %67 = vector.broadcast %cst_24 : f32 to vector<128x1xf32>
    %68 = arith.addf %64, %67 : vector<128x1xf32>
    %69 = math.rsqrt %68 : vector<128x1xf32>
    %70 = vector.broadcast %69 : vector<128x1xf32> to vector<128x128xf32>
    %71 = arith.mulf %66, %70 : vector<128x128xf32>
    %72 = vector.broadcast %7 : vector<1x128xf32> to vector<128x128xf32>
    %73 = arith.mulf %71, %72 : vector<128x128xf32>
    %74 = vector.broadcast %8 : vector<1x128xf32> to vector<128x128xf32>
    %75 = arith.addf %73, %74 : vector<128x128xf32>
    %cst_25 = arith.constant 0.000000e+00 : f32
    %76 = vector.broadcast %cst_25 : f32 to vector<128x128xf32>
    %77 = arith.maximumf %75, %76 : vector<128x128xf32>
    %78 = arith.truncf %77 : vector<128x128xf32> to vector<128x128xbf16>
    %c0_26 = arith.constant 0 : index
    %c0_27 = arith.constant 0 : index
    %79 = vector.load %arg4[%c0_26, %c0_27] : memref<128x128xbf16, #tpu.memory_space<vmem>>, vector<128x128xbf16>
    %cst_28 = arith.constant dense<0.000000e+00> : vector<128x128xf32>
    %80 = tpu.matmul %78, %79, %cst_28 {dimension_numbers = #tpu.dot_dimension_numbers<[1], [0], [0], [1], [0, 0, 1, 1], [], []>} : vector<128x128xbf16>, vector<128x128xbf16>, vector<128x128xf32> -> vector<128x128xf32>
    %81 = vector.broadcast %9 : vector<1x128xf32> to vector<128x128xf32>
    %82 = arith.addf %80, %81 : vector<128x128xf32>
    %c0_29 = arith.constant 0 : index
    %c0_30 = arith.constant 0 : index
    %83 = vector.load %arg6[%c0_29, %c0_30] : memref<128x128xf32, #tpu.memory_space<vmem>>, vector<128x128xf32>
    tpu.vector_store %arg6[%c0_29, %c0_30], %82 {strides = array<i32>} : memref<128x128xf32, #tpu.memory_space<vmem>>, vector<128x128xf32>,
    return
  }
}

</mosaic_0001>

<bundles_post_ra>
// kernel: gnn_forward.1
= control target key start
LH: loop header
LB: loop body
LE: loop exit
PB: predicated region body
PF: predicated region fallthrough
CT: control target
= control target key end

     0   :  { %v73_v17 = vlaneseq  ;;  %s2562_s2 = inlined_call_operand.vmem [shape: bf16[128,128], index: 2, kind: input, shape index: {}]   ;;  %s2563_s1 = inlined_call_operand.vmem [shape: bf16[128,128], index: 1, kind: input, shape index: {}]   ;;  %s2564_s0 = inlined_call_operand.vmem [shape: bf16[128,128], index: 0, kind: input, shape index: {}]   ;;  %s2565_s5 = inlined_call_operand.vmem [shape: f32[8,128], index: 5, kind: input, shape index: {}]   ;;  %s2566_s3 = inlined_call_operand.vmem [shape: bf16[128,128], index: 3, kind: input, shape index: {}]   ;;  %s2567_s4 = inlined_call_operand.vmem [shape: bf16[128,128], index: 4, kind: input, shape index: {}]   ;;  %s2568_s6 = inlined_call_operand.vmem [shape: f32[128,128], index: 6, kind: output, shape index: {}]  }
   0x1   :  { %v1754_v0 = vld [vmem:[%s2562_s2] sm:$0xff]   ;;  %v1755_v1 = vld [vmem:[%s2562_s2 + $0x8] sm:$0xff]   ;;  %v1756_v2 = vld [vmem:[%s2562_s2 + $0x10] sm:$0xff]  }
   0x2   :  { %1578 = vmatprep.subr.bf16.mxu0 %v1754_v0  ;;  %v1757_v3 = vld [vmem:[%s2562_s2 + $0x18] sm:$0xff]   ;;  %v1762_v4 = vld [vmem:[%s2563_s1] sm:$0xff]   ;;  %v1759_v6 = vld [vmem:[%s2562_s2 + $0x28] sm:$0xff]   ;;  %v1948_v18 = vshrl.u32 %v73_v17, 7 }
   0x3   :  { %1579 = vmatpush3.bf16.msra.mxu0 %v1754_v0  ;;  %1594 = vmatprep.mubr.bf16.mxu0 %v1762_v4  ;;  %v1758_v5 = vld [vmem:[%s2562_s2 + $0x20] sm:$0xff]   ;;  %v1760_v7 = vld [vmem:[%s2562_s2 + $0x30] sm:$0xff]   ;;  %v1761_v8 = vld [vmem:[%s2562_s2 + $0x38] sm:$0xff]  }
   0x4   :  { %1580 = vmatprep.subr.bf16.mxu0 %v1755_v1  ;;  %v1763_v9 = vld [vmem:[%s2563_s1 + $0x8] sm:$0xff]   ;;  %v1764_v10 = vld [vmem:[%s2563_s1 + $0x10] sm:$0xff]   ;;  %v1765_v11 = vld [vmem:[%s2563_s1 + $0x18] sm:$0xff]   ;;  %v75_v19 = vsub.s32 0, %v1948_v18 }
   0x5   :  { %v1766_v12 = vld [vmem:[%s2563_s1 + $0x20] sm:$0xff]   ;;  %v1767_v13 = vld [vmem:[%s2563_s1 + $0x28] sm:$0xff]   ;;  %v1768_v14 = vld [vmem:[%s2563_s1 + $0x30] sm:$0xff]  }
   0x6   :  { %v1769_v15 = vld [vmem:[%s2563_s1 + $0x38] sm:$0xff]   ;;  %v1945_v16 = vld [vmem:[%s2564_s0] sm:$0xff]   ;;  %v1960_v62 = vld [vmem:[%s2564_s0 + $0x8] sm:$0xff]  }
   0x7   :  { %1581 = vmatpush3.bf16.msra.mxu0 %v1755_v1  ;;  %1626 = vmatprep.mubr.bf16.mxu1 %v1945_v16  ;;  %v1954_v20 = vld [vmem:[%s2565_s5] sm:$0xff]  ;;  %v1965_v63 = vld [vmem:[%s2564_s0 + $0x10] sm:$0xff]   ;;  %v1972_v0 = vld [vmem:[%s2564_s0 + $0x18] sm:$0xff]  }
   0x8   :  { %1582 = vmatprep.subr.bf16.mxu0 %v1756_v2  ;;  %v76_v21 = vrot.slane %v1954_v20, %v75_v19  ;;  %v1977_v1 = vld [vmem:[%s2564_s0 + $0x20] sm:$0xff]   ;;  %v1996_v4 = vld [vmem:[%s2564_s0 + $0x38] sm:$0xff]  }
   0xb   :  { %1583 = vmatpush3.bf16.msra.mxu0 %v1756_v2  ;;  %v1984_v2 = vld [vmem:[%s2564_s0 + $0x28] sm:$0xff]  }
   0xc   :  { %1584 = vmatprep.subr.bf16.mxu0 %v1757_v3 }
   0xf   :  { %1585 = vmatpush3.bf16.msra.mxu0 %v1757_v3  ;;  %v1989_v3 = vld [vmem:[%s2564_s0 + $0x30] sm:$0xff]  }
  0x10   :  { %1586 = vmatprep.subr.bf16.mxu0 %v1758_v5 }
  0x13   :  { %1587 = vmatpush3.bf16.msra.mxu0 %v1758_v5  ;;  %v280_v5 = vsub.s32 1, %v1948_v18 }
  0x14   :  { %1588 = vmatprep.subr.bf16.mxu0 %v1759_v6 }
  0x17   :  { %1589 = vmatpush3.bf16.msra.mxu0 %v1759_v6  ;;  %v2002_v6 = vrot.slane %v1954_v20, %v280_v5 }
  0x18   :  { %1590 = vmatprep.subr.bf16.mxu0 %v1760_v7 }
  0x1b   :  { %1591 = vmatpush3.bf16.msra.mxu0 %v1760_v7 }
  0x1c   :  { %1592 = vmatprep.subr.bf16.mxu0 %v1761_v8 }
  0x1f   :  { %1593 = vmatpush3.bf16.msra.mxu0 %v1761_v8 }
  0x22   :  { %1595 = vmatmul.mubr.bf16.vlgmr.msra.gmra.mrb[0].mxu0 %v1763_v9 }
  0x23   :  { %1598 = vmatprep.mubr.bf16.mxu0 %v1764_v10 }
  0x2a   :  { %1599 = vmatmul.mubr.bf16.gmra.mrb[4].mxu0 %v1765_v11 }
  0x2b   :  { %1602 = vmatprep.mubr.bf16.mxu0 %v1766_v12 }
  0x32   :  { %1603 = vmatmul.mubr.bf16.gmra.mrb[8].mxu0 %v1767_v13 }
  0x33   :  { %1606 = vmatprep.mubr.bf16.mxu0 %v1768_v14 }
  0x3a   :  { %1607 = vmatmul.mubr.bf16.gmra.mrb[12].mxu0 %v1769_v15 }
  0xf5   :  { %v1596_v22 = vpop.f32.mrb[0].mxu0 }
  0xf6   :  { %v207_v23 = vpop.f32.mrb[1].mxu0  ;;  %v216_v25 = vadd.f32 %v1596_v22, %v76_v21 }
  0xf7   :  { %v1597_v24 = vpop.f32.mrb[2].mxu0  ;;  %v208_v28 = vadd.f32 %v207_v23, %v76_v21 }
  0xf8   :  { %v219_v26 = vadd.f32 %v1597_v24, %v76_v21  ;;  %v210_v27 = vpop.f32.mrb[3].mxu0 }
  0xf9   :  { %v211_v29 = vadd.f32 %v210_v27, %v76_v21 }
  0xfa   :  { %v271_v30 = vpack.c.bf16 %v219_v26, %v216_v25 }
  0xfb   :  { %v270_v31 = vpack.c.bf16 %v211_v29, %v208_v28 }
  0xfd   :  { %v1600_v32 = vpop.f32.mrb[4].mxu0  ;;  %1610 = vmatprep.subr.bf16.mxu1 %v270_v31 }
  0xfe   :  { %v223_v33 = vpop.f32.mrb[5].mxu0  ;;  %1611 = vmatpush3.bf16.msra.mxu1 %v270_v31  ;;  %v232_v35 = vadd.f32 %v1600_v32, %v76_v21 }
  0xff   :  { %v1601_v34 = vpop.f32.mrb[6].mxu0  ;;  %1612 = vmatprep.subr.bf16.mxu1 %v271_v30  ;;  %v224_v38 = vadd.f32 %v223_v33, %v76_v21 }
 0x100   :  { %v235_v36 = vadd.f32 %v1601_v34, %v76_v21  ;;  %v226_v37 = vpop.f32.mrb[7].mxu0 }
 0x101   :  { %v227_v39 = vadd.f32 %v226_v37, %v76_v21 }
 0x102   :  { %v273_v40 = vpack.c.bf16 %v235_v36, %v232_v35  ;;  %1613 = vmatpush3.bf16.msra.mxu1 %v271_v30 }
 0x103   :  { %v272_v41 = vpack.c.bf16 %v227_v39, %v224_v38  ;;  %v1778_v38 = vld [vmem:[%s2566_s3] sm:$0xff]  }
 0x104   :  { %1642 = vmatprep.subr.bf16.mxu0 %v1778_v38 }
 0x105   :  { %v1604_v42 = vpop.f32.mrb[8].mxu0  ;;  %1614 = vmatprep.subr.bf16.mxu1 %v272_v41  ;;  %1643 = vmatpush3.bf16.msra.mxu0 %v1778_v38 }
 0x106   :  { %v239_v43 = vpop.f32.mrb[9].mxu0  ;;  %1615 = vmatpush3.bf16.msra.mxu1 %v272_v41  ;;  %v248_v45 = vadd.f32 %v1604_v42, %v76_v21  ;;  %v1779_v42 = vld [vmem:[%s2566_s3 + $0x8] sm:$0xff]  }
 0x107   :  { %v1605_v44 = vpop.f32.mrb[10].mxu0  ;;  %1616 = vmatprep.subr.bf16.mxu1 %v273_v40  ;;  %v240_v48 = vadd.f32 %v239_v43, %v76_v21  ;;  %1644 = vmatprep.subr.bf16.mxu0 %v1779_v42 }
 0x108   :  { %v251_v46 = vadd.f32 %v1605_v44, %v76_v21  ;;  %v242_v47 = vpop.f32.mrb[11].mxu0 }
 0x109   :  { %v243_v49 = vadd.f32 %v242_v47, %v76_v21  ;;  %1645 = vmatpush3.bf16.msra.mxu0 %v1779_v42 }
 0x10a   :  { %v275_v50 = vpack.c.bf16 %v251_v46, %v248_v45  ;;  %1617 = vmatpush3.bf16.msra.mxu1 %v273_v40  ;;  %v1780_v45 = vld [vmem:[%s2566_s3 + $0x10] sm:$0xff]  }
 0x10b   :  { %v274_v51 = vpack.c.bf16 %v243_v49, %v240_v48  ;;  %1646 = vmatprep.subr.bf16.mxu0 %v1780_v45  ;;  %v1781_v48 = vld [vmem:[%s2566_s3 + $0x18] sm:$0xff]  }
 0x10d   :  { %v1608_v52 = vpop.f32.mrb[12].mxu0  ;;  %1618 = vmatprep.subr.bf16.mxu1 %v274_v51  ;;  %1647 = vmatpush3.bf16.msra.mxu0 %v1780_v45 }
 0x10e   :  { %v255_v53 = vpop.f32.mrb[13].mxu0  ;;  %1619 = vmatpush3.bf16.msra.mxu1 %v274_v51  ;;  %v264_v55 = vadd.f32 %v1608_v52, %v76_v21  ;;  %1648 = vmatprep.subr.bf16.mxu0 %v1781_v48  ;;  %v1782_v51 = vld [vmem:[%s2566_s3 + $0x20] sm:$0xff]  }
 0x10f   :  { %v1609_v54 = vpop.f32.mrb[14].mxu0  ;;  %1620 = vmatprep.subr.bf16.mxu1 %v275_v50  ;;  %v256_v58 = vadd.f32 %v255_v53, %v76_v21 }
 0x110   :  { %v267_v56 = vadd.f32 %v1609_v54, %v76_v21  ;;  %v258_v57 = vpop.f32.mrb[15].mxu0  ;;  %v1783_v54 = vld [vmem:[%s2566_s3 + $0x28] sm:$0xff]  }
 0x111   :  { %v259_v59 = vadd.f32 %v258_v57, %v76_v21  ;;  %1649 = vmatpush3.bf16.msra.mxu0 %v1781_v48  ;;  %v1784_v57 = vld [vmem:[%s2566_s3 + $0x30] sm:$0xff]  }
 0x112   :  { %v277_v60 = vpack.c.bf16 %v267_v56, %v264_v55  ;;  %1621 = vmatpush3.bf16.msra.mxu1 %v275_v50  ;;  %1650 = vmatprep.subr.bf16.mxu0 %v1782_v51 }
 0x113   :  { %v276_v61 = vpack.c.bf16 %v259_v59, %v256_v58 }
 0x115   :  { %1622 = vmatprep.subr.bf16.mxu1 %v276_v61  ;;  %1651 = vmatpush3.bf16.msra.mxu0 %v1782_v51 }
 0x116   :  { %1623 = vmatpush3.bf16.msra.mxu1 %v276_v61  ;;  %1652 = vmatprep.subr.bf16.mxu0 %v1783_v54 }
 0x117   :  { %1624 = vmatprep.subr.bf16.mxu1 %v277_v60 }
 0x119   :  { %1653 = vmatpush3.bf16.msra.mxu0 %v1783_v54 }
 0x11a   :  { %1625 = vmatpush3.bf16.msra.mxu1 %v277_v60  ;;  %1654 = vmatprep.subr.bf16.mxu0 %v1784_v57  ;;  %v1785_v60 = vld [vmem:[%s2566_s3 + $0x38] sm:$0xff]  }
 0x11d   :  { %1627 = vmatmul.mubr.bf16.vlgmr.msra.gmra.mrb[0].mxu1 %v1960_v62  ;;  %1655 = vmatpush3.bf16.msra.mxu0 %v1784_v57 }
 0x11e   :  { %1630 = vmatprep.mubr.bf16.mxu1 %v1965_v63  ;;  %1656 = vmatprep.subr.bf16.mxu0 %v1785_v60 }
 0x121   :  { %1657 = vmatpush3.bf16.msra.mxu0 %v1785_v60 }
 0x125   :  { %1631 = vmatmul.mubr.bf16.gmra.mrb[4].mxu1 %v1972_v0 }
 0x126   :  { %1634 = vmatprep.mubr.bf16.mxu1 %v1977_v1 }
 0x12d   :  { %1635 = vmatmul.mubr.bf16.gmra.mrb[8].mxu1 %v1984_v2 }
 0x12e   :  { %1638 = vmatprep.mubr.bf16.mxu1 %v1989_v3 }
 0x135   :  { %1639 = vmatmul.mubr.bf16.gmra.mrb[12].mxu1 %v1996_v4 }
 0x136   :  { %1690 = vmatprep.mubr.bf16.mxu1 %v1945_v16 }
 0x1f0   :  { %v1628_v7 = vpop.f32.mrb[0].mxu1 }
 0x1f1   :  { %v2005_v8 = vadd.f32 %v1628_v7, %v2002_v6  ;;  %v364_v9 = vpop.f32.mrb[1].mxu1 }
 0x1f2   :  { %v2008_v10 = vadd.f32 %v364_v9, %v2002_v6  ;;  %v1629_v11 = vpop.f32.mrb[2].mxu1 }
 0x1f3   :  { %431 = vadd.xlane.f32.xlu1 %v2005_v8  ;;  %v367_v12 = vpop.f32.mrb[3].mxu1  ;;  %v2013_v13 = vadd.f32 %v1629_v11, %v2002_v6  ;;  %v477_v14 = vmul.f32 %v2005_v8, %v2005_v8 }
 0x1f4   :  { %427 = vadd.xlane.f32.xlu0 %v2008_v10  ;;  %v2019_v16 = vadd.f32 %v367_v12, %v2002_v6  ;;  %v475_v24 = vmul.f32 %v2008_v10, %v2008_v10 }
 0x1f5   :  { %v478_v17 = vmul.f32 %v2013_v13, %v2013_v13 }
 0x1f6   :  { %v476_v23 = vmul.f32 %v2019_v16, %v2019_v16 }
 0x1f7   :  { %433 = vadd.xlane.f32.xlu1 %v2013_v13 }
 0x1f8   :  { %495 = vadd.xlane.f32.xlu0 %v477_v14  ;;  %v1632_v15 = vpop.f32.mrb[4].mxu1 }
 0x1f9   :  { %v380_v19 = vpop.f32.mrb[5].mxu1  ;;  %v2032_v28 = vadd.f32 %v1632_v15, %v2002_v6 }
 0x1fa   :  { %v1633_v21 = vpop.f32.mrb[6].mxu1  ;;  %v2040_v32 = vadd.f32 %v380_v19, %v2002_v6 }
 0x1fb   :  { %497 = vadd.xlane.f32.xlu1 %v478_v17  ;;  %v383_v22 = vpop.f32.mrb[7].mxu1  ;;  %v2029_v25 = vadd.f32 %v1633_v21, %v2002_v6  ;;  %v481_v36 = vmul.f32 %v2032_v28, %v2032_v28 }
 0x1fc   :  { %429 = vadd.xlane.f32.xlu0 %v2019_v16  ;;  %v2037_v31 = vadd.f32 %v383_v22, %v2002_v6  ;;  %v479_v41 = vmul.f32 %v2040_v32, %v2040_v32 }
 0x1fd   :  { %v482_v34 = vmul.f32 %v2029_v25, %v2029_v25 }
 0x1fe   :  { %v480_v40 = vmul.f32 %v2037_v31, %v2037_v31 }
 0x1ff   :  { %493 = vadd.xlane.f32.xlu1 %v476_v23 }
 0x200   :  { %491 = vadd.xlane.f32.xlu0 %v475_v24  ;;  %v1636_v26 = vpop.f32.mrb[8].mxu1 }
 0x201   :  { %v396_v27 = vpop.f32.mrb[9].mxu1  ;;  %v2062_v44 = vadd.f32 %v1636_v26, %v2002_v6 }
 0x202   :  { %v1637_v29 = vpop.f32.mrb[10].mxu1  ;;  %v2073_v47 = vadd.f32 %v396_v27, %v2002_v6 }
 0x203   :  { %441 = vadd.xlane.f32.xlu1 %v2029_v25  ;;  %v399_v30 = vpop.f32.mrb[11].mxu1  ;;  %v2059_v43 = vadd.f32 %v1637_v29, %v2002_v6  ;;  %v485_v50 = vmul.f32 %v2062_v44, %v2062_v44 }
 0x204   :  { %439 = vadd.xlane.f32.xlu0 %v2032_v28  ;;  %v2070_v46 = vadd.f32 %v399_v30, %v2002_v6  ;;  %v483_v53 = vmul.f32 %v2073_v47, %v2073_v47 }
 0x205   :  { %v486_v49 = vmul.f32 %v2059_v43, %v2059_v43 }
 0x206   :  { %v484_v52 = vmul.f32 %v2070_v46, %v2070_v46 }
 0x207   :  { %437 = vadd.xlane.f32.xlu1 %v2037_v31 }
 0x208   :  { %435 = vadd.xlane.f32.xlu0 %v2040_v32  ;;  %v1640_v33 = vpop.f32.mrb[12].mxu1 }
 0x209   :  { %v412_v35 = vpop.f32.mrb[13].mxu1  ;;  %v2098_v56 = vadd.f32 %v1640_v33, %v2002_v6 }
 0x20a   :  { %v1641_v37 = vpop.f32.mrb[14].mxu1  ;;  %v2109_v59 = vadd.f32 %v412_v35, %v2002_v6 }
 0x20b   :  { %505 = vadd.xlane.f32.xlu1 %v482_v34  ;;  %v415_v39 = vpop.f32.mrb[15].mxu1  ;;  %v2095_v55 = vadd.f32 %v1641_v37, %v2002_v6  ;;  %v489_v7 = vmul.f32 %v2098_v56, %v2098_v56 }
 0x20c   :  { %503 = vadd.xlane.f32.xlu0 %v481_v36  ;;  %v2106_v58 = vadd.f32 %v415_v39, %v2002_v6  ;;  %v487_v5 = vmul.f32 %v2109_v59, %v2109_v59 }
 0x20d   :  { %v490_v6 = vmul.f32 %v2095_v55, %v2095_v55 }
 0x20e   :  { %v488_v61 = vmul.f32 %v2106_v58, %v2106_v58 }
 0x20f   :  { %501 = vadd.xlane.f32.xlu1 %v480_v40 }
 0x210   :  { %499 = vadd.xlane.f32.xlu0 %v479_v41 }
 0x213   :  { %449 = vadd.xlane.f32.xlu1 %v2059_v43 }
 0x214   :  { %447 = vadd.xlane.f32.xlu0 %v2062_v44 }
 0x217   :  { %445 = vadd.xlane.f32.xlu1 %v2070_v46 }
 0x218   :  { %443 = vadd.xlane.f32.xlu0 %v2073_v47 }
 0x21b   :  { %513 = vadd.xlane.f32.xlu1 %v486_v49 }
 0x21c   :  { %511 = vadd.xlane.f32.xlu0 %v485_v50 }
 0x21f   :  { %509 = vadd.xlane.f32.xlu1 %v484_v52 }
 0x220   :  { %507 = vadd.xlane.f32.xlu0 %v483_v53 }
 0x223   :  { %457 = vadd.xlane.f32.xlu1 %v2095_v55 }
 0x224   :  { %455 = vadd.xlane.f32.xlu0 %v2098_v56 }
 0x227   :  { %453 = vadd.xlane.f32.xlu1 %v2106_v58 }
 0x228   :  { %451 = vadd.xlane.f32.xlu0 %v2109_v59 }
 0x22b   :  { %517 = vadd.xlane.f32.xlu1 %v488_v61 }
 0x22c   :  { %515 = vadd.xlane.f32.xlu0 %v487_v5 }
 0x22f   :  { %521 = vadd.xlane.f32.xlu1 %v490_v6 }
 0x230   :  { %519 = vadd.xlane.f32.xlu0 %v489_v7 }
 0x280   :  { %v432_v9 = vpop.xlane.xlu1 %431 }
 0x281   :  { %v428_v11 = vpop.xlane.xlu0 %427  ;;  %v461_v12 = vmul.f32 0.03125, %v432_v9  ;;  %v653_v9 = vsub.s32 2, %v1948_v18 }
 0x282   :  { %v2124_v29 = vmul.f32 0.03125, %v428_v11 }
 0x283   :  { %v541_v19 = vmul.f32 %v461_v12, %v461_v12 }
 0x284   :  { %v434_v14 = vpop.xlane.xlu1 %433  ;;  %v539_v41 = vmul.f32 %v2124_v29, %v2124_v29 }
 0x285   :  { %v462_v15 = vmul.f32 0.03125, %v434_v14  ;;  %v496_v17 = vpop.xlane.xlu0 %495  ;;  %v589_v14 = vsub.f32 %v2005_v8, %v461_v12 }
 0x286   :  { %v525_v21 = vmul.f32 0.03125, %v496_v17 }
 0x287   :  { %v542_v24 = vmul.f32 %v462_v15, %v462_v15 }
 0x288   :  { %v557_v22 = vsub.f32 %v525_v21, %v541_v19  ;;  %v498_v23 = vpop.xlane.xlu1 %497 }
 0x289   :  { %v526_v26 = vmul.f32 0.03125, %v498_v23  ;;  %v430_v27 = vpop.xlane.xlu0 %429  ;;  %v590_v23 = vsub.f32 %v2013_v13, %v462_v15 }
 0x28a   :  { %v573_v30 = vmax.f32 %v557_v22, 0.0  ;;  %v2126_v33 = vmul.f32 0.03125, %v430_v27 }
 0x28b   :  { %v558_v34 = vsub.f32 %v526_v26, %v542_v24 }
 0x28c   :  { %v605_v35 = vadd.f32 1e-05, %v573_v30  ;;  %v540_v36 = vmul.f32 %v2126_v33, %v2126_v33  ;;  %v494_v37 = vpop.xlane.xlu1 %493  ;;  %v588_v13 = vsub.f32 %v2019_v16, %v2126_v33 }
 0x28d   :  { %v574_v38 = vmax.f32 %v558_v34, 0.0  ;;  %v524_v39 = vmul.f32 0.03125, %v494_v37  ;;  %v492_v40 = vpop.xlane.xlu0 %491 }
 0x28e   :  { %v523_v42 = vmul.f32 0.03125, %v492_v40  ;;  %1794 = vrsqrt.f32 %v605_v35  ;;  %v673_v35 = vsub.s32 3, %v1948_v18 }
 0x28f   :  { %v606_v45 = vadd.f32 1e-05, %v574_v38  ;;  %v556_v48 = vsub.f32 %v524_v39, %v540_v36  ;;  %v2149_v38 = vrot.slane %v1954_v20, %v653_v9 }
 0x290   :  { %v555_v49 = vsub.f32 %v523_v42, %v539_v41  ;;  %v442_v50 = vpop.xlane.xlu1 %441  ;;  %v2161_v16 = vrot.slane %v1954_v20, %v673_v35 }
 0x291   :  { %1796 = vrsqrt.f32 %v606_v45  ;;  %v572_v51 = vmax.f32 %v556_v48, 0.0  ;;  %v440_v52 = vpop.xlane.xlu0 %439  ;;  %v2132_v61 = vmul.f32 0.03125, %v442_v50 }
 0x292   :  { %v571_v53 = vmax.f32 %v555_v49, 0.0  ;;  %v2134_v6 = vmul.f32 0.03125, %v440_v52 }
 0x293   :  { %v604_v54 = vadd.f32 1e-05, %v572_v51  ;;  %v546_v17 = vmul.f32 %v2132_v61, %v2132_v61  ;;  %v587_v51 = vsub.f32 %v2008_v10, %v2124_v29 }
 0x294   :  { %v603_v57 = vadd.f32 1e-05, %v571_v53  ;;  %v438_v60 = vpop.xlane.xlu1 %437  ;;  %v545_v24 = vmul.f32 %v2134_v6, %v2134_v6 }
 0x295   :  { %1798 = vrsqrt.f32 %v604_v54  ;;  %v436_v5 = vpop.xlane.xlu0 %435  ;;  %v2140_v19 = vmul.f32 0.03125, %v438_v60 }
 0x296   :  { %1800 = vrsqrt.f32 %v603_v57  ;;  %v2145_v26 = vmul.f32 0.03125, %v436_v5 }
 0x297   :  { %v544_v15 = vmul.f32 %v2140_v19, %v2140_v19 }
 0x298   :  { %v506_v7 = vpop.xlane.xlu1 %505  ;;  %v1795_v11 = vpop.eup %1794  ;;  %v543_v42 = vmul.f32 %v2145_v26, %v2145_v26 }
 0x299   :  { %v530_v21 = vmul.f32 0.03125, %v506_v7  ;;  %v504_v22 = vpop.xlane.xlu0 %503  ;;  %v637_v8 = vmul.f32 %v1795_v11, %v589_v14 }
 0x29a   :  { %v529_v27 = vmul.f32 0.03125, %v504_v22 }
 0x29b   :  { %v1797_v30 = vpop.eup %1796  ;;  %v562_v34 = vsub.f32 %v530_v21, %v546_v17  ;;  %v657_v7 = vmul.f32 %v2149_v38, %v637_v8 }
 0x29c   :  { %v638_v12 = vmul.f32 %v1797_v30, %v590_v23  ;;  %v561_v36 = vsub.f32 %v529_v27, %v545_v24  ;;  %v502_v37 = vpop.xlane.xlu1 %501 }
 0x29d   :  { %v578_v39 = vmax.f32 %v562_v34, 0.0  ;;  %v528_v40 = vmul.f32 0.03125, %v502_v37  ;;  %v500_v41 = vpop.xlane.xlu0 %499  ;;  %v677_v30 = vadd.f32 %v2161_v16, %v657_v7 }
 0x29e   :  { %v577_v45 = vmax.f32 %v561_v36, 0.0  ;;  %v527_v48 = vmul.f32 0.03125, %v500_v41  ;;  %v658_v49 = vmul.f32 %v2149_v38, %v638_v12 }
 0x29f   :  { %v1799_v50 = vpop.eup %1798  ;;  %v610_v52 = vadd.f32 1e-05, %v578_v39  ;;  %v560_v53 = vsub.f32 %v528_v40, %v544_v15  ;;  %v594_v15 = vsub.f32 %v2029_v25, %v2132_v61  ;;  %v693_v40 = vmax.f32 %v677_v30, 0.0 }
 0x2a0   :  { %v1801_v33 = vpop.eup %1800  ;;  %v609_v54 = vadd.f32 1e-05, %v577_v45  ;;  %v559_v57 = vsub.f32 %v527_v48, %v543_v42  ;;  %v450_v60 = vpop.xlane.xlu1 %449  ;;  %v636_v5 = vmul.f32 %v1799_v50, %v588_v13  ;;  %v678_v29 = vadd.f32 %v2161_v16, %v658_v49 }
 0x2a1   :  { %1802 = vrsqrt.f32 %v610_v52  ;;  %v576_v9 = vmax.f32 %v560_v53, 0.0  ;;  %v448_v11 = vpop.xlane.xlu0 %447  ;;  %v635_v14 = vmul.f32 %v1801_v33, %v587_v51  ;;  %v2169_v34 = vmul.f32 0.03125, %v450_v60 }
 0x2a2   :  { %1804 = vrsqrt.f32 %v609_v54  ;;  %v575_v17 = vmax.f32 %v559_v57, 0.0  ;;  %v656_v10 = vmul.f32 %v2149_v38, %v636_v5  ;;  %v2172_v12 = vmul.f32 0.03125, %v448_v11 }
 0x2a3   :  { %v608_v21 = vadd.f32 1e-05, %v576_v9  ;;  %v655_v22 = vmul.f32 %v2149_v38, %v635_v14  ;;  %v694_v37 = vmax.f32 %v678_v29, 0.0  ;;  %v550_v41 = vmul.f32 %v2169_v34, %v2169_v34 }
 0x2a4   :  { %v607_v23 = vadd.f32 1e-05, %v575_v17  ;;  %v446_v24 = vpop.xlane.xlu1 %445  ;;  %v676_v27 = vadd.f32 %v2161_v16, %v656_v10  ;;  %v549_v50 = vmul.f32 %v2172_v12, %v2172_v12  ;;  %v593_v25 = vsub.f32 %v2032_v28, %v2134_v6 }
 0x2a5   :  { %1806 = vrsqrt.f32 %v608_v21  ;;  %v444_v35 = vpop.xlane.xlu0 %443  ;;  %v675_v8 = vadd.f32 %v2161_v16, %v655_v22  ;;  %v2178_v42 = vmul.f32 0.03125, %v446_v24  ;;  %v708_v53 = vpack.c.bf16 %v694_v37, %v693_v40 }
 0x2a6   :  { %1808 = vrsqrt.f32 %v607_v23  ;;  %v692_v36 = vmax.f32 %v676_v27, 0.0  ;;  %v2182_v51 = vmul.f32 0.03125, %v444_v35  ;;  %v592_v57 = vsub.f32 %v2037_v31, %v2140_v19 }
 0x2a7   :  { %v691_v13 = vmax.f32 %v675_v8, 0.0  ;;  %v548_v9 = vmul.f32 %v2178_v42, %v2178_v42  ;;  %v591_v31 = vsub.f32 %v2040_v32, %v2145_v26 }
 0x2a8   :  { %v514_v39 = vpop.xlane.xlu1 %513  ;;  %v547_v28 = vmul.f32 %v2182_v51, %v2182_v51 }
 0x2a9   :  { %v534_v45 = vmul.f32 0.03125, %v514_v39  ;;  %v512_v48 = vpop.xlane.xlu0 %511  ;;  %v707_v49 = vpack.c.bf16 %v692_v36, %v691_v13 }
 0x2aa   :  { %v533_v52 = vmul.f32 0.03125, %v512_v48 }
 0x2ab   :  { %v1803_v33 = vpop.eup %1802  ;;  %v566_v61 = vsub.f32 %v534_v45, %v550_v41  ;;  %1658 = vmatprep.mubr.bf16.mxu0 %v707_v49 }
 0x2ac   :  { %v1805_v54 = vpop.eup %1804  ;;  %v565_v60 = vsub.f32 %v533_v52, %v549_v50  ;;  %v510_v5 = vpop.xlane.xlu1 %509  ;;  %1659 = vmatmul.mubr.bf16.vlgmr.msra.gmra.mrb[16].mxu0 %v708_v53  ;;  %v642_v7 = vmul.f32 %v1803_v33, %v594_v15 }
 0x2ad   :  { %v582_v11 = vmax.f32 %v566_v61, 0.0  ;;  %v532_v14 = vmul.f32 0.03125, %v510_v5  ;;  %v508_v17 = vpop.xlane.xlu0 %507  ;;  %v641_v10 = vmul.f32 %v1805_v54, %v593_v25  ;;  %v598_v5 = vsub.f32 %v2059_v43, %v2169_v34 }
 0x2ae   :  { %v581_v6 = vmax.f32 %v565_v60, 0.0  ;;  %v531_v29 = vmul.f32 0.03125, %v508_v17  ;;  %v662_v21 = vmul.f32 %v2149_v38, %v642_v7  ;;  %v597_v43 = vsub.f32 %v2062_v44, %v2172_v12 }
 0x2af   :  { %v1807_v22 = vpop.eup %1806  ;;  %v614_v19 = vadd.f32 1e-05, %v582_v11  ;;  %v564_v23 = vsub.f32 %v532_v14, %v548_v9  ;;  %v661_v15 = vmul.f32 %v2149_v38, %v641_v10 }
 0x2b0   :  { %v1809_v24 = vpop.eup %1808  ;;  %v613_v27 = vadd.f32 1e-05, %v581_v6  ;;  %v563_v30 = vsub.f32 %v531_v29, %v547_v28  ;;  %v458_v35 = vpop.xlane.xlu1 %457  ;;  %v640_v8 = vmul.f32 %v1807_v22, %v592_v57  ;;  %v682_v41 = vadd.f32 %v2161_v16, %v662_v21 }
 0x2b1   :  { %1810 = vrsqrt.f32 %v614_v19  ;;  %v580_v36 = vmax.f32 %v564_v23, 0.0  ;;  %v456_v37 = vpop.xlane.xlu0 %455  ;;  %v639_v13 = vmul.f32 %v1809_v24, %v591_v31  ;;  %v681_v33 = vadd.f32 %v2161_v16, %v661_v15 }
 0x2b2   :  { %1812 = vrsqrt.f32 %v613_v27  ;;  %v579_v39 = vmax.f32 %v563_v30, 0.0  ;;  %v660_v40 = vmul.f32 %v2149_v38, %v640_v8  ;;  %v698_v54 = vmax.f32 %v682_v41, 0.0 }
 0x2b3   :  { %v612_v32 = vadd.f32 1e-05, %v580_v36  ;;  %v659_v26 = vmul.f32 %v2149_v38, %v639_v13  ;;  %v697_v60 = vmax.f32 %v681_v33, 0.0  ;;  %v2208_v9 = vmul.f32 0.03125, %v458_v35 }
 0x2b4   :  { %v611_v45 = vadd.f32 1e-05, %v579_v39  ;;  %v454_v48 = vpop.xlane.xlu1 %453  ;;  %v680_v49 = vadd.f32 %v2161_v16, %v660_v40  ;;  %v2212_v28 = vmul.f32 0.03125, %v456_v37  ;;  %v596_v19 = vsub.f32 %v2070_v46, %v2178_v42 }
 0x2b5   :  { %1814 = vrsqrt.f32 %v612_v32  ;;  %v2200_v50 = vmul.f32 0.03125, %v454_v48  ;;  %v452_v52 = vpop.xlane.xlu0 %451  ;;  %v679_v53 = vadd.f32 %v2161_v16, %v659_v26  ;;  %v710_v21 = vpack.c.bf16 %v698_v54, %v697_v60 }
 0x2b6   :  { %1816 = vrsqrt.f32 %v611_v45  ;;  %v2204_v25 = vmul.f32 0.03125, %v452_v52  ;;  %v696_v61 = vmax.f32 %v680_v49, 0.0  ;;  %v554_v30 = vmul.f32 %v2208_v9, %v2208_v9 }
 0x2b7   :  { %v695_v57 = vmax.f32 %v679_v53, 0.0  ;;  %v552_v11 = vmul.f32 %v2200_v50, %v2200_v50  ;;  %v553_v44 = vmul.f32 %v2212_v28, %v2212_v28  ;;  %v595_v46 = vsub.f32 %v2073_v47, %v2182_v51 }
 0x2b8   :  { %v518_v7 = vpop.xlane.xlu1 %517  ;;  %v551_v6 = vmul.f32 %v2204_v25, %v2204_v25 }
 0x2b9   :  { %v536_v14 = vmul.f32 0.03125, %v518_v7  ;;  %v516_v17 = vpop.xlane.xlu0 %515  ;;  %v709_v10 = vpack.c.bf16 %v696_v61, %v695_v57 }
 0x2ba   :  { %v535_v29 = vmul.f32 0.03125, %v516_v17 }
 0x2bb   :  { %v1811_v22 = vpop.eup %1810  ;;  %v568_v34 = vsub.f32 %v536_v14, %v552_v11  ;;  %1662 = vmatprep.mubr.bf16.mxu0 %v709_v10 }
 0x2bc   :  { %v1813_v31 = vpop.eup %1812  ;;  %v567_v23 = vsub.f32 %v535_v29, %v551_v6  ;;  %v522_v24 = vpop.xlane.xlu1 %521  ;;  %1663 = vmatmul.mubr.bf16.gmra.mrb[20].mxu0 %v710_v21  ;;  %v646_v27 = vmul.f32 %v1811_v22, %v598_v5  ;;  %v600_v6 = vsub.f32 %v2106_v58, %v2200_v50  ;;  %v599_v22 = vsub.f32 %v2109_v59, %v2204_v25 }
 0x2bd   :  { %v584_v35 = vmax.f32 %v568_v34, 0.0  ;;  %v538_v8 = vmul.f32 0.03125, %v522_v24  ;;  %v520_v36 = vpop.xlane.xlu0 %519  ;;  %v645_v37 = vmul.f32 %v1813_v31, %v597_v43 }
 0x2be   :  { %v583_v12 = vmax.f32 %v567_v23, 0.0  ;;  %v537_v13 = vmul.f32 0.03125, %v520_v36  ;;  %v666_v15 = vmul.f32 %v2149_v38, %v646_v27  ;;  %v601_v27 = vsub.f32 %v2098_v56, %v2212_v28 }
 0x2bf   :  { %v1815_v39 = vpop.eup %1814  ;;  %v616_v42 = vadd.f32 1e-05, %v584_v35  ;;  %v570_v40 = vsub.f32 %v538_v8, %v554_v30  ;;  %v665_v41 = vmul.f32 %v2149_v38, %v645_v37 }
 0x2c0   :  { %v1817_v32 = vpop.eup %1816  ;;  %v615_v26 = vadd.f32 1e-05, %v583_v12  ;;  %v569_v45 = vsub.f32 %v537_v13, %v553_v44  ;;  %v644_v48 = vmul.f32 %v1815_v39, %v596_v19  ;;  %v686_v53 = vadd.f32 %v2161_v16, %v666_v15 }
 0x2c1   :  { %1818 = vrsqrt.f32 %v616_v42  ;;  %v586_v49 = vmax.f32 %v570_v40, 0.0  ;;  %v643_v52 = vmul.f32 %v1817_v32, %v595_v46  ;;  %v685_v54 = vadd.f32 %v2161_v16, %v665_v41 }
 0x2c2   :  { %1820 = vrsqrt.f32 %v615_v26  ;;  %v585_v33 = vmax.f32 %v569_v45, 0.0  ;;  %v664_v61 = vmul.f32 %v2149_v38, %v644_v48  ;;  %v702_v14 = vmax.f32 %v686_v53, 0.0 }
 0x2c3   :  { %v618_v47 = vadd.f32 1e-05, %v586_v49  ;;  %v663_v51 = vmul.f32 %v2149_v38, %v643_v52  ;;  %v701_v11 = vmax.f32 %v685_v54, 0.0  ;;  %v602_v19 = vsub.f32 %v2095_v55, %v2208_v9 }
 0x2c4   :  { %v617_v57 = vadd.f32 1e-05, %v585_v33  ;;  %v684_v60 = vadd.f32 %v2161_v16, %v664_v61 }
 0x2c5   :  { %1822 = vrsqrt.f32 %v618_v47  ;;  %v683_v5 = vadd.f32 %v2161_v16, %v663_v51  ;;  %v712_v29 = vpack.c.bf16 %v702_v14, %v701_v11  ;;  %v886_v11 = vsub.s32 4, %v1948_v18 }
 0x2c6   :  { %1824 = vrsqrt.f32 %v617_v57  ;;  %v700_v7 = vmax.f32 %v684_v60, 0.0 }
 0x2c7   :  { %v699_v17 = vmax.f32 %v683_v5, 0.0  ;;  %v2259_v14 = vrot.slane %v1954_v20, %v886_v11 }
 0x2c9   :  { %v711_v10 = vpack.c.bf16 %v700_v7, %v699_v17 }
 0x2cb   :  { %v1819_v21 = vpop.eup %1818  ;;  %1666 = vmatprep.mubr.bf16.mxu0 %v711_v10 }
 0x2cc   :  { %v1821_v43 = vpop.eup %1820  ;;  %1667 = vmatmul.mubr.bf16.gmra.mrb[24].mxu0 %v712_v29  ;;  %v648_v34 = vmul.f32 %v1819_v21, %v600_v6 }
 0x2cd   :  { %v647_v31 = vmul.f32 %v1821_v43, %v599_v22 }
 0x2ce   :  { %v668_v23 = vmul.f32 %v2149_v38, %v648_v34 }
 0x2cf   :  { %v1823_v24 = vpop.eup %1822  ;;  %v667_v58 = vmul.f32 %v2149_v38, %v647_v31 }
 0x2d0   :  { %v1825_v50 = vpop.eup %1824  ;;  %v688_v30 = vadd.f32 %v2161_v16, %v668_v23  ;;  %v650_v59 = vmul.f32 %v1823_v24, %v602_v19 }
 0x2d1   :  { %v687_v25 = vadd.f32 %v2161_v16, %v667_v58  ;;  %v649_v35 = vmul.f32 %v1825_v50, %v601_v27 }
 0x2d2   :  { %v704_v8 = vmax.f32 %v688_v30, 0.0  ;;  %v670_v36 = vmul.f32 %v2149_v38, %v650_v59 }
 0x2d3   :  { %v703_v37 = vmax.f32 %v687_v25, 0.0  ;;  %v669_v55 = vmul.f32 %v2149_v38, %v649_v35 }
 0x2d4   :  { %v690_v9 = vadd.f32 %v2161_v16, %v670_v36 }
 0x2d5   :  { %v713_v44 = vpack.c.bf16 %v704_v8, %v703_v37  ;;  %v689_v56 = vadd.f32 %v2161_v16, %v669_v55 }
 0x2d6   :  { %v706_v28 = vmax.f32 %v690_v9, 0.0 }
 0x2d7   :  { %1670 = vmatprep.mubr.bf16.mxu0 %v713_v44  ;;  %v705_v12 = vmax.f32 %v689_v56, 0.0  ;;  %v1786_v56 = vld [vmem:[%s2567_s4] sm:$0xff]  }
 0x2d8   :  { %1706 = vmatprep.subr.bf16.mxu0 %v1786_v56 }
 0x2d9   :  { %v714_v13 = vpack.c.bf16 %v706_v28, %v705_v12  ;;  %1707 = vmatpush3.bf16.msra.mxu0 %v1786_v56  ;;  %v1787_v12 = vld [vmem:[%s2567_s4 + $0x8] sm:$0xff]  }
 0x2da   :  { %1708 = vmatprep.subr.bf16.mxu0 %v1787_v12 }
 0x2db   :  { %1671 = vmatmul.mubr.bf16.gmra.mrb[28].mxu0 %v714_v13 }
 0x2dd   :  { %1709 = vmatpush3.bf16.msra.mxu0 %v1787_v12 }
 0x37f   :  { %v1660_v15 = vpop.f32.mrb[16].mxu0 }
 0x380   :  { %v813_v39 = vpop.f32.mrb[17].mxu0 }
 0x381   :  { %v1661_v46 = vpop.f32.mrb[18].mxu0 }
 0x382   :  { %v877_v42 = vpack.c.bf16 %v1661_v46, %v1660_v15  ;;  %v816_v40 = vpop.f32.mrb[19].mxu0 }
 0x383   :  { %v876_v41 = vpack.c.bf16 %v816_v40, %v813_v39  ;;  %v1788_v39 = vld [vmem:[%s2567_s4 + $0x10] sm:$0xff]   ;;  %v1789_v40 = vld [vmem:[%s2567_s4 + $0x18] sm:$0xff]  }
 0x384   :  { %1710 = vmatprep.subr.bf16.mxu0 %v1788_v39 }
 0x385   :  { %1674 = vmatprep.subr.bf16.mxu1 %v876_v41  ;;  %1711 = vmatpush3.bf16.msra.mxu0 %v1788_v39 }
 0x386   :  { %1675 = vmatpush3.bf16.msra.mxu1 %v876_v41  ;;  %1712 = vmatprep.subr.bf16.mxu0 %v1789_v40 }
 0x387   :  { %1676 = vmatprep.subr.bf16.mxu1 %v877_v42 }
 0x389   :  { %1713 = vmatpush3.bf16.msra.mxu0 %v1789_v40 }
 0x38a   :  { %1677 = vmatpush3.bf16.msra.mxu1 %v877_v42 }
 0x38f   :  { %v1664_v38 = vpop.f32.mrb[20].mxu0 }
 0x390   :  { %v829_v32 = vpop.f32.mrb[21].mxu0 }
 0x391   :  { %v1665_v26 = vpop.f32.mrb[22].mxu0 }
 0x392   :  { %v879_v45 = vpack.c.bf16 %v1665_v26, %v1664_v38  ;;  %v832_v16 = vpop.f32.mrb[23].mxu0  ;;  %v1790_v26 = vld [vmem:[%s2567_s4 + $0x20] sm:$0xff]  }
 0x393   :  { %v878_v48 = vpack.c.bf16 %v832_v16, %v829_v32  ;;  %1714 = vmatprep.subr.bf16.mxu0 %v1790_v26  ;;  %v1791_v16 = vld [vmem:[%s2567_s4 + $0x28] sm:$0xff]  }
 0x394   :  { %1715 = vmatpush3.bf16.msra.mxu0 %v1790_v26 }
 0x395   :  { %1678 = vmatprep.subr.bf16.mxu1 %v878_v48  ;;  %1716 = vmatprep.subr.bf16.mxu0 %v1791_v16 }
 0x396   :  { %1679 = vmatpush3.bf16.msra.mxu1 %v878_v48 }
 0x397   :  { %1680 = vmatprep.subr.bf16.mxu1 %v879_v45 }
 0x398   :  { %1717 = vmatpush3.bf16.msra.mxu0 %v1791_v16 }
 0x39a   :  { %1681 = vmatpush3.bf16.msra.mxu1 %v879_v45 }
 0x39f   :  { %v1668_v49 = vpop.f32.mrb[24].mxu0 }
 0x3a0   :  { %v845_v52 = vpop.f32.mrb[25].mxu0 }
 0x3a1   :  { %v1669_v53 = vpop.f32.mrb[26].mxu0 }
 0x3a2   :  { %v881_v33 = vpack.c.bf16 %v1669_v53, %v1668_v49  ;;  %v848_v61 = vpop.f32.mrb[27].mxu0 }
 0x3a3   :  { %v880_v54 = vpack.c.bf16 %v848_v61, %v845_v52  ;;  %v1792_v52 = vld [vmem:[%s2567_s4 + $0x30] sm:$0xff]   ;;  %v1793_v61 = vld [vmem:[%s2567_s4 + $0x38] sm:$0xff]  }
 0x3a4   :  { %1718 = vmatprep.subr.bf16.mxu0 %v1792_v52 }
 0x3a5   :  { %1682 = vmatprep.subr.bf16.mxu1 %v880_v54  ;;  %1719 = vmatpush3.bf16.msra.mxu0 %v1792_v52 }
 0x3a6   :  { %1683 = vmatpush3.bf16.msra.mxu1 %v880_v54  ;;  %1720 = vmatprep.subr.bf16.mxu0 %v1793_v61 }
 0x3a7   :  { %1684 = vmatprep.subr.bf16.mxu1 %v881_v33 }
 0x3a9   :  { %1721 = vmatpush3.bf16.msra.mxu0 %v1793_v61 }
 0x3aa   :  { %1685 = vmatpush3.bf16.msra.mxu1 %v881_v33 }
 0x3ae   :  { %v1672_v47 = vpop.f32.mrb[28].mxu0 }
 0x3af   :  { %v861_v51 = vpop.f32.mrb[29].mxu0 }
 0x3b0   :  { %v1673_v57 = vpop.f32.mrb[30].mxu0 }
 0x3b1   :  { %v883_v60 = vpack.c.bf16 %v1673_v57, %v1672_v47  ;;  %v864_v5 = vpop.f32.mrb[31].mxu0 }
 0x3b2   :  { %v882_v7 = vpack.c.bf16 %v864_v5, %v861_v51 }
 0x3b4   :  { %1686 = vmatprep.subr.bf16.mxu1 %v882_v7 }
 0x3b5   :  { %1687 = vmatpush3.bf16.msra.mxu1 %v882_v7 }
 0x3b6   :  { %1688 = vmatprep.subr.bf16.mxu1 %v883_v60 }
 0x3b9   :  { %1689 = vmatpush3.bf16.msra.mxu1 %v883_v60 }
 0x3ba   :  { %1738 = vmatprep.subr.bf16.mxu1 %v1786_v56 }
 0x3bc   :  { %1691 = vmatmul.mubr.bf16.vlgmr.msra.gmra.mrb[16].mxu1 %v1960_v62 }
 0x3bd   :  { %1694 = vmatprep.mubr.bf16.mxu1 %v1965_v63  ;;  %1746 = vmatpush3.bf16.msra.mxu1 %v1786_v56 }
 0x3be   :  { %1739 = vmatprep.subr.bf16.mxu1 %v1787_v12 }
 0x3c1   :  { %1747 = vmatpush3.bf16.msra.mxu1 %v1787_v12 }
 0x3c2   :  { %1740 = vmatprep.subr.bf16.mxu1 %v1788_v39 }
 0x3c4   :  { %1695 = vmatmul.mubr.bf16.gmra.mrb[20].mxu1 %v1972_v0 }
 0x3c5   :  { %1698 = vmatprep.mubr.bf16.mxu1 %v1977_v1  ;;  %1748 = vmatpush3.bf16.msra.mxu1 %v1788_v39 }
 0x3c6   :  { %1741 = vmatprep.subr.bf16.mxu1 %v1789_v40 }
 0x3c9   :  { %1749 = vmatpush3.bf16.msra.mxu1 %v1789_v40 }
 0x3ca   :  { %1742 = vmatprep.subr.bf16.mxu1 %v1790_v26 }
 0x3cc   :  { %1699 = vmatmul.mubr.bf16.gmra.mrb[24].mxu1 %v1984_v2 }
 0x3cd   :  { %1702 = vmatprep.mubr.bf16.mxu1 %v1989_v3  ;;  %1750 = vmatpush3.bf16.msra.mxu1 %v1790_v26  ;;  %v1211_v26 = vsub.s32 5, %v1948_v18 }
 0x3ce   :  { %1743 = vmatprep.subr.bf16.mxu1 %v1791_v16 }
 0x3d1   :  { %1751 = vmatpush3.bf16.msra.mxu1 %v1791_v16 }
 0x3d2   :  { %1744 = vmatprep.subr.bf16.mxu1 %v1792_v52 }
 0x3d4   :  { %1703 = vmatmul.mubr.bf16.gmra.mrb[28].mxu1 %v1996_v4 }
 0x3d5   :  { %1752 = vmatpush3.bf16.msra.mxu1 %v1792_v52 }
 0x3d6   :  { %1745 = vmatprep.subr.bf16.mxu1 %v1793_v61 }
 0x3d9   :  { %1753 = vmatpush3.bf16.msra.mxu1 %v1793_v61 }
 0x48f   :  { %v1692_v17 = vpop.f32.mrb[16].mxu1 }
 0x490   :  { %v2262_v62 = vadd.f32 %v1692_v17, %v2259_v14  ;;  %v922_v63 = vpop.f32.mrb[17].mxu1 }
 0x491   :  { %v1693_v10 = vpop.f32.mrb[18].mxu1  ;;  %v2269_v2 = vadd.f32 %v922_v63, %v2259_v14 }
 0x492   :  { %v2265_v0 = vadd.f32 %v1693_v10, %v2259_v14  ;;  %989 = vadd.xlane.f32.xlu0 %v2262_v62  ;;  %v925_v1 = vpop.f32.mrb[19].mxu1  ;;  %v1035_v4 = vmul.f32 %v2262_v62, %v2262_v62 }
 0x493   :  { %v2273_v20 = vadd.f32 %v925_v1, %v2259_v14  ;;  %v1033_v43 = vmul.f32 %v2269_v2, %v2269_v2 }
 0x494   :  { %991 = vadd.xlane.f32.xlu1 %v2265_v0  ;;  %v1036_v21 = vmul.f32 %v2265_v0, %v2265_v0 }
 0x495   :  { %v1034_v31 = vmul.f32 %v2273_v20, %v2273_v20 }
 0x496   :  { %985 = vadd.xlane.f32.xlu0 %v2269_v2 }
 0x497   :  { %v1696_v3 = vpop.f32.mrb[20].mxu1 }
 0x498   :  { %987 = vadd.xlane.f32.xlu1 %v2273_v20  ;;  %v938_v6 = vpop.f32.mrb[21].mxu1  ;;  %v2284_v34 = vadd.f32 %v1696_v3, %v2259_v14 }
 0x499   :  { %v1697_v29 = vpop.f32.mrb[22].mxu1  ;;  %v2293_v50 = vadd.f32 %v938_v6, %v2259_v14 }
 0x49a   :  { %1053 = vadd.xlane.f32.xlu0 %v1035_v4  ;;  %v941_v22 = vpop.f32.mrb[23].mxu1  ;;  %v2289_v27 = vadd.f32 %v1697_v29, %v2259_v14  ;;  %v1039_v25 = vmul.f32 %v2284_v34, %v2284_v34 }
 0x49b   :  { %v2297_v30 = vadd.f32 %v941_v22, %v2259_v14  ;;  %v1037_v55 = vmul.f32 %v2293_v50, %v2293_v50 }
 0x49c   :  { %1055 = vadd.xlane.f32.xlu1 %v1036_v21  ;;  %v1040_v36 = vmul.f32 %v2289_v27, %v2289_v27 }
 0x49d   :  { %v1038_v44 = vmul.f32 %v2297_v30, %v2297_v30 }
 0x49e   :  { %1049 = vadd.xlane.f32.xlu0 %v1033_v43 }
 0x49f   :  { %v1700_v19 = vpop.f32.mrb[24].mxu1 }
 0x4a0   :  { %1051 = vadd.xlane.f32.xlu1 %v1034_v31  ;;  %v954_v23 = vpop.f32.mrb[25].mxu1  ;;  %v2308_v9 = vadd.f32 %v1700_v19, %v2259_v14 }
 0x4a1   :  { %v1701_v24 = vpop.f32.mrb[26].mxu1  ;;  %v2323_v13 = vadd.f32 %v954_v23, %v2259_v14 }
 0x4a2   :  { %997 = vadd.xlane.f32.xlu0 %v2284_v34  ;;  %v957_v58 = vpop.f32.mrb[27].mxu1  ;;  %v2316_v28 = vadd.f32 %v1701_v24, %v2259_v14  ;;  %v1043_v46 = vmul.f32 %v2308_v9, %v2308_v9 }
 0x4a3   :  { %v2327_v15 = vadd.f32 %v957_v58, %v2259_v14  ;;  %v1041_v41 = vmul.f32 %v2323_v13, %v2323_v13 }
 0x4a4   :  { %999 = vadd.xlane.f32.xlu1 %v2289_v27  ;;  %v1044_v42 = vmul.f32 %v2316_v28, %v2316_v28 }
 0x4a5   :  { %v1042_v32 = vmul.f32 %v2327_v15, %v2327_v15 }
 0x4a6   :  { %993 = vadd.xlane.f32.xlu0 %v2293_v50 }
 0x4a7   :  { %v1704_v59 = vpop.f32.mrb[28].mxu1 }
 0x4a8   :  { %995 = vadd.xlane.f32.xlu1 %v2297_v30  ;;  %v970_v35 = vpop.f32.mrb[29].mxu1  ;;  %v2344_v38 = vadd.f32 %v1704_v59, %v2259_v14 }
 0x4a9   :  { %v1705_v8 = vpop.f32.mrb[30].mxu1  ;;  %v2359_v48 = vadd.f32 %v970_v35, %v2259_v14 }
 0x4aa   :  { %1061 = vadd.xlane.f32.xlu0 %v1039_v25  ;;  %v973_v37 = vpop.f32.mrb[31].mxu1  ;;  %v2352_v45 = vadd.f32 %v1705_v8, %v2259_v14  ;;  %v1047_v54 = vmul.f32 %v2344_v38, %v2344_v38 }
 0x4ab   :  { %v2363_v49 = vadd.f32 %v973_v37, %v2259_v14  ;;  %v1045_v53 = vmul.f32 %v2359_v48, %v2359_v48 }
 0x4ac   :  { %1063 = vadd.xlane.f32.xlu1 %v1040_v36  ;;  %v1048_v47 = vmul.f32 %v2352_v45, %v2352_v45 }
 0x4ad   :  { %v1046_v33 = vmul.f32 %v2363_v49, %v2363_v49 }
 0x4ae   :  { %1057 = vadd.xlane.f32.xlu0 %v1037_v55 }
 0x4b0   :  { %1059 = vadd.xlane.f32.xlu1 %v1038_v44 }
 0x4b2   :  { %1005 = vadd.xlane.f32.xlu0 %v2308_v9 }
 0x4b4   :  { %1007 = vadd.xlane.f32.xlu1 %v2316_v28 }
 0x4b6   :  { %1001 = vadd.xlane.f32.xlu0 %v2323_v13 }
 0x4b8   :  { %1003 = vadd.xlane.f32.xlu1 %v2327_v15 }
 0x4ba   :  { %1069 = vadd.xlane.f32.xlu0 %v1043_v46 }
 0x4bc   :  { %1071 = vadd.xlane.f32.xlu1 %v1044_v42 }
 0x4be   :  { %1065 = vadd.xlane.f32.xlu0 %v1041_v41 }
 0x4c0   :  { %1067 = vadd.xlane.f32.xlu1 %v1042_v32 }
 0x4c2   :  { %1013 = vadd.xlane.f32.xlu0 %v2344_v38 }
 0x4c4   :  { %1015 = vadd.xlane.f32.xlu1 %v2352_v45 }
 0x4c6   :  { %1009 = vadd.xlane.f32.xlu0 %v2359_v48 }
 0x4c8   :  { %1011 = vadd.xlane.f32.xlu1 %v2363_v49 }
 0x4ca   :  { %1073 = vadd.xlane.f32.xlu0 %v1045_v53 }
 0x4cc   :  { %1075 = vadd.xlane.f32.xlu1 %v1046_v33 }
 0x4ce   :  { %1077 = vadd.xlane.f32.xlu0 %v1047_v54 }
 0x4d0   :  { %1079 = vadd.xlane.f32.xlu1 %v1048_v47  ;;  %v1231_v47 = vsub.s32 6, %v1948_v18 }
 0x51f   :  { %v990_v51 = vpop.xlane.xlu0 %989 }
 0x520   :  { %v1019_v5 = vmul.f32 0.03125, %v990_v51 }
 0x521   :  { %v992_v57 = vpop.xlane.xlu1 %991 }
 0x522   :  { %v1020_v11 = vmul.f32 0.03125, %v992_v57  ;;  %v1099_v17 = vmul.f32 %v1019_v5, %v1019_v5  ;;  %v1147_v33 = vsub.f32 %v2262_v62, %v1019_v5 }
 0x523   :  { %v986_v60 = vpop.xlane.xlu0 %985 }
 0x524   :  { %v2381_v63 = vmul.f32 0.03125, %v986_v60  ;;  %v1100_v4 = vmul.f32 %v1020_v11, %v1020_v11 }
 0x525   :  { %v988_v7 = vpop.xlane.xlu1 %987 }
 0x526   :  { %v2383_v1 = vmul.f32 0.03125, %v988_v7  ;;  %v1097_v22 = vmul.f32 %v2381_v63, %v2381_v63 }
 0x527   :  { %v1054_v14 = vpop.xlane.xlu0 %1053 }
 0x528   :  { %v1083_v10 = vmul.f32 0.03125, %v1054_v14  ;;  %v1098_v23 = vmul.f32 %v2383_v1, %v2383_v1  ;;  %v1148_v14 = vsub.f32 %v2265_v0, %v1020_v11  ;;  %v1145_v0 = vsub.f32 %v2269_v2, %v2381_v63 }
 0x529   :  { %v1056_v3 = vpop.xlane.xlu1 %1055 }
 0x52a   :  { %v1115_v6 = vsub.f32 %v1083_v10, %v1099_v17  ;;  %v1084_v29 = vmul.f32 0.03125, %v1056_v3  ;;  %v2408_v3 = vld [vmem:[%s2565_s5] sm:$0xff] }
 0x52b   :  { %v1050_v21 = vpop.xlane.xlu0 %1049  ;;  %v2411_v62 = vrot.slane %v2408_v3, %v1211_v26 }
 0x52c   :  { %v1131_v43 = vmax.f32 %v1115_v6, 0.0  ;;  %v1116_v31 = vsub.f32 %v1084_v29, %v1100_v4  ;;  %v1081_v19 = vmul.f32 0.03125, %v1050_v21 }
 0x52d   :  { %v1052_v24 = vpop.xlane.xlu1 %1051 }
 0x52e   :  { %v1163_v58 = vadd.f32 1e-05, %v1131_v43  ;;  %v1132_v59 = vmax.f32 %v1116_v31, 0.0  ;;  %v1113_v25 = vsub.f32 %v1081_v19, %v1097_v22  ;;  %v1082_v35 = vmul.f32 0.03125, %v1052_v24 }
 0x52f   :  { %v998_v8 = vpop.xlane.xlu0 %997  ;;  %v2420_v31 = vrot.slane %v2408_v3, %v1231_v47 }
 0x530   :  { %1826 = vrsqrt.f32 %v1163_v58  ;;  %v1164_v36 = vadd.f32 1e-05, %v1132_v59  ;;  %v1129_v37 = vmax.f32 %v1113_v25, 0.0  ;;  %v1114_v55 = vsub.f32 %v1082_v35, %v1098_v23 }
 0x531   :  { %v1000_v44 = vpop.xlane.xlu1 %999  ;;  %v2389_v42 = vmul.f32 0.03125, %v998_v8  ;;  %v1146_v25 = vsub.f32 %v2273_v20, %v2383_v1 }
 0x532   :  { %1828 = vrsqrt.f32 %v1164_v36  ;;  %v1161_v56 = vadd.f32 1e-05, %v1129_v37  ;;  %v1130_v12 = vmax.f32 %v1114_v55, 0.0  ;;  %v2391_v41 = vmul.f32 0.03125, %v1000_v44 }
 0x533   :  { %v994_v39 = vpop.xlane.xlu0 %993  ;;  %v1103_v16 = vmul.f32 %v2389_v42, %v2389_v42 }
 0x534   :  { %1830 = vrsqrt.f32 %v1161_v56  ;;  %v1162_v46 = vadd.f32 1e-05, %v1130_v12  ;;  %v2396_v52 = vmul.f32 0.03125, %v994_v39  ;;  %v1104_v57 = vmul.f32 %v2391_v41, %v2391_v41 }
 0x535   :  { %v996_v40 = vpop.xlane.xlu1 %995 }
 0x536   :  { %1832 = vrsqrt.f32 %v1162_v46  ;;  %v2399_v61 = vmul.f32 0.03125, %v996_v40  ;;  %v1101_v4 = vmul.f32 %v2396_v52, %v2396_v52 }
 0x537   :  { %v1062_v32 = vpop.xlane.xlu0 %1061 }
 0x538   :  { %v1087_v53 = vmul.f32 0.03125, %v1062_v32  ;;  %v1102_v22 = vmul.f32 %v2399_v61, %v2399_v61 }
 0x539   :  { %v1064_v54 = vpop.xlane.xlu1 %1063 }
 0x53a   :  { %v1827_v51 = vpop.eup %1826  ;;  %v1119_v60 = vsub.f32 %v1087_v53, %v1103_v16  ;;  %v1088_v7 = vmul.f32 0.03125, %v1064_v54 }
 0x53b   :  { %v1195_v17 = vmul.f32 %v1827_v51, %v1147_v33  ;;  %v1058_v10 = vpop.xlane.xlu0 %1057 }
 0x53c   :  { %v1829_v5 = vpop.eup %1828  ;;  %v1135_v6 = vmax.f32 %v1119_v60, 0.0  ;;  %v1120_v29 = vsub.f32 %v1088_v7, %v1104_v57  ;;  %v1085_v21 = vmul.f32 0.03125, %v1058_v10 }
 0x53d   :  { %v1196_v11 = vmul.f32 %v1829_v5, %v1148_v14  ;;  %v1060_v43 = vpop.xlane.xlu1 %1059  ;;  %v1215_v2 = vmul.f32 %v2411_v62, %v1195_v17 }
 0x53e   :  { %v1831_v19 = vpop.eup %1830  ;;  %v1167_v23 = vadd.f32 1e-05, %v1135_v6  ;;  %v1136_v24 = vmax.f32 %v1120_v29, 0.0  ;;  %v1117_v58 = vsub.f32 %v1085_v21, %v1101_v4  ;;  %v1086_v59 = vmul.f32 0.03125, %v1060_v43 }
 0x53f   :  { %v1006_v35 = vpop.xlane.xlu0 %1005  ;;  %v1193_v8 = vmul.f32 %v1831_v19, %v1145_v0  ;;  %v1216_v63 = vmul.f32 %v2411_v62, %v1196_v11  ;;  %v1235_v33 = vadd.f32 %v2420_v31, %v1215_v2  ;;  %v1151_v6 = vsub.f32 %v2284_v34, %v2389_v42 }
 0x540   :  { %v1833_v36 = vpop.eup %1832  ;;  %1834 = vrsqrt.f32 %v1167_v23  ;;  %v1168_v37 = vadd.f32 1e-05, %v1136_v24  ;;  %v1133_v55 = vmax.f32 %v1117_v58, 0.0  ;;  %v1118_v44 = vsub.f32 %v1086_v59, %v1102_v22 }
 0x541   :  { %v1008_v56 = vpop.xlane.xlu1 %1007  ;;  %v1194_v12 = vmul.f32 %v1833_v36, %v1146_v25  ;;  %v1213_v39 = vmul.f32 %v2411_v62, %v1193_v8  ;;  %v1236_v20 = vadd.f32 %v2420_v31, %v1216_v63  ;;  %v2430_v53 = vmul.f32 0.03125, %v1006_v35 }
 0x542   :  { %1836 = vrsqrt.f32 %v1168_v37  ;;  %v1165_v46 = vadd.f32 1e-05, %v1133_v55  ;;  %v1134_v40 = vmax.f32 %v1118_v44, 0.0  ;;  %v2434_v51 = vmul.f32 0.03125, %v1008_v56 }
 0x543   :  { %v1002_v1 = vpop.xlane.xlu0 %1001  ;;  %v1214_v32 = vmul.f32 %v2411_v62, %v1194_v12  ;;  %v1233_v26 = vadd.f32 %v2420_v31, %v1213_v39  ;;  %v1252_v57 = vmax.f32 %v1236_v20, 0.0  ;;  %v1107_v17 = vmul.f32 %v2430_v53, %v2430_v53 }
 0x544   :  { %1838 = vrsqrt.f32 %v1165_v46  ;;  %v1166_v16 = vadd.f32 1e-05, %v1134_v40  ;;  %v2438_v10 = vmul.f32 0.03125, %v1002_v1  ;;  %v1251_v4 = vmax.f32 %v1235_v33, 0.0 }
 0x545   :  { %v1004_v54 = vpop.xlane.xlu1 %1003  ;;  %v1234_v47 = vadd.f32 %v2420_v31, %v1214_v32  ;;  %v1249_v7 = vmax.f32 %v1233_v26, 0.0  ;;  %v1108_v22 = vmul.f32 %v2434_v51, %v2434_v51  ;;  %v1152_v24 = vsub.f32 %v2289_v27, %v2391_v41 }
 0x546   :  { %1840 = vrsqrt.f32 %v1166_v16  ;;  %v2442_v29 = vmul.f32 0.03125, %v1004_v54  ;;  %v1266_v23 = vpack.c.bf16 %v1252_v57, %v1251_v4  ;;  %v1105_v34 = vmul.f32 %v2438_v10, %v2438_v10 }
 0x547   :  { %v1070_v60 = vpop.xlane.xlu0 %1069  ;;  %v1250_v14 = vmax.f32 %v1234_v47, 0.0  ;;  %v1149_v2 = vsub.f32 %v2293_v50, %v2396_v52  ;;  %v1150_v12 = vsub.f32 %v2297_v30, %v2399_v61 }
 0x548   :  { %v1091_v5 = vmul.f32 0.03125, %v1070_v60  ;;  %v1106_v63 = vmul.f32 %v2442_v29, %v2442_v29 }
 0x549   :  { %v1072_v21 = vpop.xlane.xlu1 %1071  ;;  %v1265_v0 = vpack.c.bf16 %v1250_v14, %v1249_v7 }
 0x54a   :  { %v1835_v11 = vpop.eup %1834  ;;  %v1123_v43 = vsub.f32 %v1091_v5, %v1107_v17  ;;  %v1092_v19 = vmul.f32 0.03125, %v1072_v21 }
 0x54b   :  { %1722 = vmatprep.mubr.bf16.mxu0 %v1265_v0  ;;  %v1066_v58 = vpop.xlane.xlu0 %1065  ;;  %v1199_v59 = vmul.f32 %v1835_v11, %v1151_v6 }
 0x54c   :  { %v1837_v25 = vpop.eup %1836  ;;  %v1139_v42 = vmax.f32 %v1123_v43, 0.0  ;;  %v1124_v35 = vsub.f32 %v1092_v19, %v1108_v22  ;;  %v1089_v8 = vmul.f32 0.03125, %v1066_v58  ;;  %1723 = vmatmul.mubr.bf16.vlgmr.msra.gmra.mrb[32].mxu0 %v1266_v23  ;;  %v1155_v58 = vsub.f32 %v2308_v9, %v2430_v53 }
 0x54d   :  { %v1068_v36 = vpop.xlane.xlu1 %1067  ;;  %v1200_v37 = vmul.f32 %v1837_v25, %v1152_v24  ;;  %v1219_v40 = vmul.f32 %v2411_v62, %v1199_v59 }
 0x54e   :  { %v1839_v27 = vpop.eup %1838  ;;  %v1171_v41 = vadd.f32 1e-05, %v1139_v42  ;;  %v1140_v55 = vmax.f32 %v1124_v35, 0.0  ;;  %v1121_v44 = vsub.f32 %v1089_v8, %v1105_v34  ;;  %v1090_v56 = vmul.f32 0.03125, %v1068_v36 }
 0x54f   :  { %v1014_v39 = vpop.xlane.xlu0 %1013  ;;  %v1197_v46 = vmul.f32 %v1839_v27, %v1149_v2  ;;  %v1220_v20 = vmul.f32 %v2411_v62, %v1200_v37  ;;  %v1239_v14 = vadd.f32 %v2420_v31, %v1219_v40  ;;  %v1156_v36 = vsub.f32 %v2316_v28, %v2434_v51 }
 0x550   :  { %v1841_v50 = vpop.eup %1840  ;;  %1842 = vrsqrt.f32 %v1171_v41  ;;  %v1172_v52 = vadd.f32 1e-05, %v1140_v55  ;;  %v1137_v1 = vmax.f32 %v1121_v44, 0.0  ;;  %v1122_v32 = vsub.f32 %v1090_v56, %v1106_v63 }
 0x551   :  { %v1016_v26 = vpop.xlane.xlu1 %1015  ;;  %v1198_v16 = vmul.f32 %v1841_v50, %v1150_v12  ;;  %v1217_v33 = vmul.f32 %v2411_v62, %v1197_v46  ;;  %v1240_v30 = vadd.f32 %v2420_v31, %v1220_v20  ;;  %v2468_v43 = vmul.f32 0.03125, %v1014_v39 }
 0x552   :  { %1844 = vrsqrt.f32 %v1172_v52  ;;  %v1169_v54 = vadd.f32 1e-05, %v1137_v1  ;;  %v1138_v47 = vmax.f32 %v1122_v32, 0.0  ;;  %v1255_v24 = vmax.f32 %v1239_v14, 0.0 }
 0x553   :  { %v1010_v61 = vpop.xlane.xlu0 %1009  ;;  %v1218_v57 = vmul.f32 %v2411_v62, %v1198_v16  ;;  %v1237_v60 = vadd.f32 %v2420_v31, %v1217_v33  ;;  %v1256_v21 = vmax.f32 %v1240_v30, 0.0  ;;  %v2474_v59 = vmul.f32 0.03125, %v1016_v26 }
 0x554   :  { %1846 = vrsqrt.f32 %v1169_v54  ;;  %v1170_v7 = vadd.f32 1e-05, %v1138_v47  ;;  %v2463_v17 = vmul.f32 0.03125, %v1010_v61  ;;  %v1111_v9 = vmul.f32 %v2468_v43, %v2468_v43 }
 0x555   :  { %v1012_v5 = vpop.xlane.xlu1 %1011  ;;  %v1238_v4 = vadd.f32 %v2420_v31, %v1218_v57  ;;  %v1253_v11 = vmax.f32 %v1237_v60, 0.0  ;;  %v1268_v63 = vpack.c.bf16 %v1256_v21, %v1255_v24  ;;  %v1153_v56 = vsub.f32 %v2323_v13, %v2438_v10 }
 0x556   :  { %1848 = vrsqrt.f32 %v1170_v7  ;;  %v2466_v6 = vmul.f32 0.03125, %v1012_v5  ;;  %v1109_v19 = vmul.f32 %v2463_v17, %v2463_v17  ;;  %v1112_v39 = vmul.f32 %v2474_v59, %v2474_v59 }
 0x557   :  { %v1074_v0 = vpop.xlane.xlu0 %1073  ;;  %v1254_v22 = vmax.f32 %v1238_v4, 0.0  ;;  %v1154_v52 = vsub.f32 %v2327_v15, %v2442_v29 }
 0x558   :  { %v1093_v23 = vmul.f32 0.03125, %v1074_v0  ;;  %v1110_v35 = vmul.f32 %v2466_v6, %v2466_v6  ;;  %v1158_v24 = vsub.f32 %v2363_v49, %v2466_v6 }
 0x559   :  { %v1076_v25 = vpop.xlane.xlu1 %1075  ;;  %v1267_v34 = vpack.c.bf16 %v1254_v22, %v1253_v11  ;;  %v1157_v11 = vsub.f32 %v2359_v48, %v2463_v17  ;;  %v1160_v48 = vsub.f32 %v2352_v45, %v2474_v59 }
 0x55a   :  { %v1843_v42 = vpop.eup %1842  ;;  %v1125_v8 = vsub.f32 %v1093_v23, %v1109_v19  ;;  %v1094_v2 = vmul.f32 0.03125, %v1076_v25 }
 0x55b   :  { %v1203_v37 = vmul.f32 %v1843_v42, %v1155_v58  ;;  %1726 = vmatprep.mubr.bf16.mxu0 %v1267_v34  ;;  %v1078_v27 = vpop.xlane.xlu0 %1077  ;;  %v1159_v34 = vsub.f32 %v2344_v38, %v2468_v43 }
 0x55c   :  { %v1845_v41 = vpop.eup %1844  ;;  %v1141_v53 = vmax.f32 %v1125_v8, 0.0  ;;  %v1126_v55 = vsub.f32 %v1094_v2, %v1110_v35  ;;  %v1095_v44 = vmul.f32 0.03125, %v1078_v27  ;;  %1727 = vmatmul.mubr.bf16.gmra.mrb[36].mxu0 %v1268_v63 }
 0x55d   :  { %v1204_v12 = vmul.f32 %v1845_v41, %v1156_v36  ;;  %v1080_v46 = vpop.xlane.xlu1 %1079  ;;  %v1223_v32 = vmul.f32 %v2411_v62, %v1203_v37 }
 0x55e   :  { %v1847_v28 = vpop.eup %1846  ;;  %v1173_v51 = vadd.f32 1e-05, %v1141_v53  ;;  %v1142_v40 = vmax.f32 %v1126_v55, 0.0  ;;  %v1127_v20 = vsub.f32 %v1095_v44, %v1111_v9  ;;  %v1096_v50 = vmul.f32 0.03125, %v1080_v46 }
 0x55f   :  { %v1201_v1 = vmul.f32 %v1847_v28, %v1153_v56  ;;  %v1224_v26 = vmul.f32 %v2411_v62, %v1204_v12  ;;  %v1243_v7 = vadd.f32 %v2420_v31, %v1223_v32  ;;  %v1291_v44 = vsub.s32 7, %v1948_v18 }
 0x560   :  { %v1849_v16 = vpop.eup %1848  ;;  %1850 = vrsqrt.f32 %v1173_v51  ;;  %v1174_v13 = vadd.f32 1e-05, %v1142_v40  ;;  %v1143_v10 = vmax.f32 %v1127_v20, 0.0  ;;  %v1128_v33 = vsub.f32 %v1096_v50, %v1112_v39 }
 0x561   :  { %v1202_v54 = vmul.f32 %v1849_v16, %v1154_v52  ;;  %v1221_v47 = vmul.f32 %v2411_v62, %v1201_v1  ;;  %v1244_v57 = vadd.f32 %v2420_v31, %v1224_v26  ;;  %v1259_v0 = vmax.f32 %v1243_v7, 0.0 }
 0x562   :  { %1852 = vrsqrt.f32 %v1174_v13  ;;  %v1175_v30 = vadd.f32 1e-05, %v1143_v10  ;;  %v1144_v61 = vmax.f32 %v1128_v33, 0.0  ;;  %v1292_v56 = vrot.slane %v2408_v3, %v1291_v44 }
 0x563   :  { %v1222_v15 = vmul.f32 %v2411_v62, %v1202_v54  ;;  %v1241_v29 = vadd.f32 %v2420_v31, %v1221_v47  ;;  %v1260_v5 = vmax.f32 %v1244_v57, 0.0 }
 0x564   :  { %1854 = vrsqrt.f32 %v1175_v30  ;;  %v1176_v60 = vadd.f32 1e-05, %v1144_v61 }
 0x565   :  { %v1242_v14 = vadd.f32 %v2420_v31, %v1222_v15  ;;  %v1257_v4 = vmax.f32 %v1241_v29, 0.0  ;;  %v1270_v23 = vpack.c.bf16 %v1260_v5, %v1259_v0 }
 0x566   :  { %1856 = vrsqrt.f32 %v1176_v60 }
 0x567   :  { %v1258_v21 = vmax.f32 %v1242_v14, 0.0 }
 0x569   :  { %v1269_v22 = vpack.c.bf16 %v1258_v21, %v1257_v4 }
 0x56a   :  { %v1851_v19 = vpop.eup %1850 }
 0x56b   :  { %1730 = vmatprep.mubr.bf16.mxu1 %v1269_v22  ;;  %v1205_v58 = vmul.f32 %v1851_v19, %v1157_v11 }
 0x56c   :  { %v1853_v25 = vpop.eup %1852  ;;  %1731 = vmatmul.mubr.bf16.vlgmr.msra.gmra.mrb[32].mxu1 %v1270_v23 }
 0x56d   :  { %v1206_v42 = vmul.f32 %v1853_v25, %v1158_v24  ;;  %v1225_v35 = vmul.f32 %v2411_v62, %v1205_v58 }
 0x56e   :  { %v1855_v8 = vpop.eup %1854 }
 0x56f   :  { %v1226_v17 = vmul.f32 %v2411_v62, %v1206_v42  ;;  %v1245_v2 = vadd.f32 %v2420_v31, %v1225_v35  ;;  %v1207_v63 = vmul.f32 %v1855_v8, %v1159_v34 }
 0x570   :  { %v1857_v49 = vpop.eup %1856 }
 0x571   :  { %v1246_v6 = vadd.f32 %v2420_v31, %v1226_v17  ;;  %v1208_v36 = vmul.f32 %v1857_v49, %v1160_v48  ;;  %v1227_v37 = vmul.f32 %v2411_v62, %v1207_v63  ;;  %v1261_v27 = vmax.f32 %v1245_v2, 0.0 }
 0x573   :  { %v1262_v38 = vmax.f32 %v1246_v6, 0.0  ;;  %v1228_v43 = vmul.f32 %v2411_v62, %v1208_v36  ;;  %v1247_v41 = vadd.f32 %v2420_v31, %v1227_v37 }
 0x575   :  { %v1271_v9 = vpack.c.bf16 %v1262_v38, %v1261_v27  ;;  %v1248_v45 = vadd.f32 %v2420_v31, %v1228_v43  ;;  %v1263_v59 = vmax.f32 %v1247_v41, 0.0 }
 0x577   :  { %1734 = vmatprep.mubr.bf16.mxu1 %v1271_v9  ;;  %v1264_v53 = vmax.f32 %v1248_v45, 0.0 }
 0x579   :  { %v1272_v55 = vpack.c.bf16 %v1264_v53, %v1263_v59 }
 0x57b   :  { %1735 = vmatmul.mubr.bf16.gmra.mrb[36].mxu1 %v1272_v55 }
 0x61f   :  { %v1724_v12 = vpop.f32.mrb[32].mxu0 }
 0x620   :  { %v1384_v39 = vadd.f32 %v1724_v12, %v1292_v56  ;;  %v1375_v46 = vpop.f32.mrb[33].mxu0 }
 0x621   :  { %v1376_v28 = vadd.f32 %v1375_v46, %v1292_v56  ;;  %v1725_v51 = vpop.f32.mrb[34].mxu0 }
 0x622   :  { %1440 = vst [vmem:[%s2568_s6 + $0x10] sm:$0xff] %v1384_v39  ;;  %v1387_v62 = vadd.f32 %v1725_v51, %v1292_v56  ;;  %v1378_v31 = vpop.f32.mrb[35].mxu0 }
 0x623   :  { %1438 = vst [vmem:[%s2568_s6] sm:$0xff] %v1376_v28  ;;  %v1379_v40 = vadd.f32 %v1378_v31, %v1292_v56 }
 0x624   :  { %1441 = vst [vmem:[%s2568_s6 + $0x18] sm:$0xff] %v1387_v62 }
 0x625   :  { %1439 = vst [vmem:[%s2568_s6 + $0x8] sm:$0xff] %v1379_v40 }
 0x62f   :  { %v1728_v18 = vpop.f32.mrb[36].mxu0 }
 0x630   :  { %v1400_v3 = vadd.f32 %v1728_v18, %v1292_v56  ;;  %v1391_v20 = vpop.f32.mrb[37].mxu0 }
 0x631   :  { %v1392_v50 = vadd.f32 %v1391_v20, %v1292_v56  ;;  %v1729_v52 = vpop.f32.mrb[38].mxu0 }
 0x632   :  { %1444 = vst [vmem:[%s2568_s6 + $0x30] sm:$0xff] %v1400_v3  ;;  %v1403_v1 = vadd.f32 %v1729_v52, %v1292_v56  ;;  %v1394_v32 = vpop.f32.mrb[39].mxu0 }
 0x633   :  { %1442 = vst [vmem:[%s2568_s6 + $0x20] sm:$0xff] %v1392_v50  ;;  %v1395_v26 = vadd.f32 %v1394_v32, %v1292_v56 }
 0x634   :  { %1445 = vst [vmem:[%s2568_s6 + $0x38] sm:$0xff] %v1403_v1 }
 0x635   :  { %1443 = vst [vmem:[%s2568_s6 + $0x28] sm:$0xff] %v1395_v26 }
 0x63f   :  { %v1732_v16 = vpop.f32.mrb[32].mxu1 }
 0x640   :  { %v1416_v13 = vadd.f32 %v1732_v16, %v1292_v56  ;;  %v1407_v10 = vpop.f32.mrb[33].mxu1 }
 0x641   :  { %v1408_v33 = vadd.f32 %v1407_v10, %v1292_v56  ;;  %v1733_v54 = vpop.f32.mrb[34].mxu1 }
 0x642   :  { %1448 = vst [vmem:[%s2568_s6 + $0x50] sm:$0xff] %v1416_v13  ;;  %v1419_v47 = vadd.f32 %v1733_v54, %v1292_v56  ;;  %v1410_v30 = vpop.f32.mrb[35].mxu1 }
 0x643   :  { %1446 = vst [vmem:[%s2568_s6 + $0x40] sm:$0xff] %v1408_v33  ;;  %v1411_v61 = vadd.f32 %v1410_v30, %v1292_v56 }
 0x644   :  { %1449 = vst [vmem:[%s2568_s6 + $0x58] sm:$0xff] %v1419_v47 }
 0x645   :  { %1447 = vst [vmem:[%s2568_s6 + $0x48] sm:$0xff] %v1411_v61 }
 0x64e   :  { %v1736_v57 = vpop.f32.mrb[36].mxu1 }
 0x64f   :  { %v1432_v15 = vadd.f32 %v1736_v57, %v1292_v56  ;;  %v1423_v29 = vpop.f32.mrb[37].mxu1 }
 0x650   :  { %v1424_v60 = vadd.f32 %v1423_v29, %v1292_v56  ;;  %v1737_v7 = vpop.f32.mrb[38].mxu1 }
 0x651   :  { %1452 = vst [vmem:[%s2568_s6 + $0x70] sm:$0xff] %v1432_v15  ;;  %v1435_v14 = vadd.f32 %v1737_v7, %v1292_v56  ;;  %v1426_v5 = vpop.f32.mrb[39].mxu1 }
 0x652   :  { %1450 = vst [vmem:[%s2568_s6 + $0x60] sm:$0xff] %v1424_v60  ;;  %v1427_v4 = vadd.f32 %v1426_v5, %v1292_v56 }
 0x653   :  { %1453 = vst [vmem:[%s2568_s6 + $0x78] sm:$0xff] %v1435_v14 }
 0x654   :  { %1451 = vst [vmem:[%s2568_s6 + $0x68] sm:$0xff] %v1427_v4 }

</bundles_post_ra>
